<compile_context>
chip_gen: v5e
topology: v5e:2x2
jax: 0.10.0
libtpu: 0.0.40
codegen_flags: <defaults>
</compile_context>

<pallas_src>
import functools

import jax
import jax.numpy as jnp
from jax import lax
from jax.experimental import pallas as pl
from jax.experimental.pallas import tpu as pltpu


# 48 MiB scoped VMEM: above the 32 MiB default (helps v5e/v6e streaming tiles),
# still well under v7x's 64 MiB physical capacity.
_VMEM_LIMIT = 48 * 1024 * 1024


def _mosaic_params(*sem):
    return pltpu.CompilerParams(
        dimension_semantics=sem, vmem_limit_bytes=_VMEM_LIMIT
    )


# ---------------------------------------------------------------------------
# Pallas kernels
# ---------------------------------------------------------------------------
def _pointwise_linear_kernel(x_ref, w_ref, b_ref, o_ref):
    # x: (TM, Cin), w: (Cin, Cout) bf16 (pre-cast), b: (1, Cout) f32 -> o: (TM, Cout)
    acc = jnp.dot(
        x_ref[...].astype(jnp.bfloat16),
        w_ref[...],
        preferred_element_type=jnp.float32,
    )
    o_ref[...] = (acc + b_ref[...]).astype(o_ref.dtype)


def pointwise_linear(x2d, w_in_out, bias, *, out_dtype=None, tm=1024):
    """1x1 conv == per-pixel linear layer; row-tiled, pipelined Pallas matmul."""
    M, Cin = x2d.shape
    Cout = w_in_out.shape[1]
    out_dtype = x2d.dtype if out_dtype is None else out_dtype
    tm = min(tm, M)  # tm==M -> full-dim exemption; otherwise 1024 is sublane-aligned
    grid = (pl.cdiv(M, tm),)
    return pl.pallas_call(
        _pointwise_linear_kernel,
        out_shape=jax.ShapeDtypeStruct((M, Cout), out_dtype),
        grid=grid,
        in_specs=[
            pl.BlockSpec((tm, Cin), lambda i: (i, 0)),
            pl.BlockSpec((Cin, Cout), lambda i: (0, 0)),
            pl.BlockSpec((1, Cout), lambda i: (0, 0)),
        ],
        out_specs=pl.BlockSpec((tm, Cout), lambda i: (i, 0)),
        compiler_params=_mosaic_params("parallel"),
    )(x2d, w_in_out, bias.reshape(1, Cout).astype(jnp.float32))


def _attention_kernel(q_ref, kv_ref, bias_ref, wo_ref, bo_ref, o_ref, acc_ref,
                      *, n_head, hc, C):
    # q:    (TB, M, C)        bf16   (softmax scale already folded into k)
    # kv:   (TB, n, 2C)       bf16   (fused k|v slab; split via static lane slices)
    # bias: (TB, n_head, M, n) bf16
    # wo:   (C, C) bf16, bo: (1, C) f32 (fused proj_out)
    # o:    (TB, M, C) out dtype
    # acc:  (TB, M, C) bf16 VMEM scratch (per-head direct stores, no concatenate)
    q = q_ref[...]
    kv = kv_ref[...]
    bias = bias_ref[...]
    for h in range(n_head):
        sl = slice(h * hc, (h + 1) * hc)
        qh = q[:, :, sl]                              # (TB, M, hc)  bf16
        kh = kv[:, :, sl]                             # (TB, n, hc)  bf16
        vh = kv[:, :, C + h * hc:C + (h + 1) * hc]    # (TB, n, hc)  bf16
        # batched QK^T across the TB blocked windows (MXU, f32 accumulation)
        s = jnp.einsum("bmd,bnd->bmn", qh, kh, preferred_element_type=jnp.float32)
        s = s + bias[:, h].astype(jnp.float32)
        m = jnp.max(s, axis=-1, keepdims=True)
        e = jnp.exp(s - m)
        l = jnp.sum(e, axis=-1, keepdims=True)
        oh = jnp.einsum("bmn,bnd->bmd", e.astype(jnp.bfloat16), vh,
                        preferred_element_type=jnp.float32)
        # normalize the small (TB, M, hc) output; EUP reciprocal; direct store
        acc_ref[:, :, sl] = (oh * pl.reciprocal(l, approx=True)).astype(jnp.bfloat16)
    tb, M, _ = acc_ref.shape
    # fused proj_out: one (TB*M, C) @ (C, C) matmul + bias, then a single store.
    a = acc_ref[...].reshape(tb * M, C)
    y = jnp.dot(a, wo_ref[...], preferred_element_type=jnp.float32) + bo_ref[...]
    o_ref[...] = y.reshape(tb, M, C).astype(o_ref.dtype)


def _choose_window_block(B, M, n, C, n_head, budget_bytes=12 * 1024 * 1024):
    """Windows per attention grid step: amortize step overhead, fit v7x VMEM,
    keep >=2 grid steps so both cores stay busy under 'parallel' semantics."""
    per_win = 2 * (M * C * 2 + n * 2 * C * 2 + n_head * M * n * 2 + M * C * 4)
    per_win += M * C * 2  # single-buffered bf16 scratch
    tb = max(1, min(B, budget_bytes // max(per_win, 1)))
    if B > 1:
        tb = min(tb, -(-B // 2))
    return tb


def deformable_attention_core(q_bmc, kv_bn2c, bias_bhmn, woT, bo, *, n_head,
                              out_dtype):
    """softmax(q k^T + bias) @ v followed by the fused output projection."""
    B, M, C = q_bmc.shape
    n = kv_bn2c.shape[1]
    hc = C // n_head
    tb = _choose_window_block(B, M, n, C, n_head)
    kernel = functools.partial(_attention_kernel, n_head=n_head, hc=hc, C=C)
    return pl.pallas_call(
        kernel,
        out_shape=jax.ShapeDtypeStruct((B, M, C), out_dtype),
        grid=(pl.cdiv(B, tb),),
        in_specs=[
            pl.BlockSpec((tb, M, C), lambda b: (b, 0, 0)),
            pl.BlockSpec((tb, n, 2 * C), lambda b: (b, 0, 0)),
            pl.BlockSpec((tb, n_head, M, n), lambda b: (b, 0, 0, 0)),
            pl.BlockSpec((C, C), lambda b: (0, 0)),
            pl.BlockSpec((1, C), lambda b: (0, 0)),
        ],
        out_specs=pl.BlockSpec((tb, M, C), lambda b: (b, 0, 0)),
        scratch_shapes=[pltpu.VMEM((tb, M, C), jnp.bfloat16)],
        compiler_params=_mosaic_params("parallel"),
    )(q_bmc, kv_bn2c, bias_bhmn, woT, bo)


# ---------------------------------------------------------------------------
# Plain-JAX glue (matches PyTorch semantics), channels-last
# ---------------------------------------------------------------------------
def grid_sample_bilinear_nhwc(img, grid):
    """F.grid_sample(mode='bilinear', padding_mode='zeros', align_corners=True).

    img:  (N, Hi, Wi, C) channels-last; grid: (N, ..., 2) with (x, y) in [-1, 1].
    """
    N, Hi, Wi, C = img.shape
    gx = (grid[..., 0] + 1.0) * 0.5 * (Wi - 1)
    gy = (grid[..., 1] + 1.0) * 0.5 * (Hi - 1)
    x0 = jnp.floor(gx)
    x1 = x0 + 1.0
    y0 = jnp.floor(gy)
    y1 = y0 + 1.0
    wx1 = gx - x0
    wx0 = 1.0 - wx1
    wy1 = gy - y0
    wy0 = 1.0 - wy1
    img_flat = img.reshape(N, Hi * Wi, C)
    spatial = gx.shape[1:]

    def gather(xi, yi):
        valid = ((xi >= 0) & (xi <= Wi - 1) & (yi >= 0) & (yi <= Hi - 1)).astype(
            img.dtype
        )
        xc = jnp.clip(xi, 0, Wi - 1).astype(jnp.int32)
        yc = jnp.clip(yi, 0, Hi - 1).astype(jnp.int32)
        idx = (yc * Wi + xc).reshape(N, -1, 1)
        vals = jnp.take_along_axis(
            img_flat, jnp.broadcast_to(idx, (N, idx.shape[1], C)), axis=1
        ).reshape(N, *spatial, C)
        return vals * valid[..., None]

    return (
        gather(x0, y0) * (wx0 * wy0)[..., None]
        + gather(x1, y0) * (wx1 * wy0)[..., None]
        + gather(x0, y1) * (wx0 * wy1)[..., None]
        + gather(x1, y1) * (wx1 * wy1)[..., None]
    )


def get_ref_points(Hk, Wk, B, n_group, dtype=jnp.float32):
    ref_y = jnp.linspace(0.5, Hk - 0.5, Hk, dtype=dtype)
    ref_x = jnp.linspace(0.5, Wk - 0.5, Wk, dtype=dtype)
    ry, rx = jnp.meshgrid(ref_y, ref_x, indexing="ij")
    ref = jnp.stack((ry, rx), axis=-1)
    ref = ref.at[..., 1].set(ref[..., 1] / Wk * 2 - 1)
    ref = ref.at[..., 0].set(ref[..., 0] / Hk * 2 - 1)
    return jnp.broadcast_to(ref[None], (B * n_group, Hk, Wk, 2))


# ---------------------------------------------------------------------------
# One-time weight prep (called once, outside jit): transpose / fuse / cast to bf16,
# fold the softmax scale into the k projection (mathematically identical to q*k*scale,
# and keeps the offset-net input q identical to PyTorch).
# ---------------------------------------------------------------------------
def prepare_params(raw, n_head):
    C = raw["wq"].shape[0]
    hc = C // n_head
    scale = hc ** (-0.5)
    bf = jnp.bfloat16
    return dict(
        wqT=raw["wq"].T.astype(bf),
        bq=raw["bq"].astype(jnp.float32),
        w_kvT=jnp.concatenate([(raw["wk"] * scale).T, raw["wv"].T], axis=1).astype(bf),
        b_kv=jnp.concatenate([raw["bk"] * scale, raw["bv"]], axis=0).astype(jnp.float32),
        woT=raw["wo"].T.astype(bf),
        bo=raw["bo"].reshape(1, C).astype(jnp.float32),
        w_dw_hwio=raw["w_dw"].transpose(2, 3, 1, 0).astype(bf),  # (kk, kk, 1, gc)
        b_dw=raw["b_dw"].astype(jnp.float32),
        ln_g=raw["ln_g"].astype(jnp.float32),
        ln_b=raw["ln_b"].astype(jnp.float32),
        w_offT=raw["w_off"].T.astype(jnp.float32),               # (gc, 2)
        rpe_table=raw["rpe_table"].astype(jnp.float32),
    )


# ---------------------------------------------------------------------------
# Forward pass (use_pe=True, dwc_pe=False, fixed_pe=False, no_off=False, eval mode)
# ---------------------------------------------------------------------------
def dat_swin_d_attention_forward(params, x, window_size, cfg):
    # TODO(synk): attention `mask` path, dwc_pe / fixed_pe PE variants and
    # train-mode dropout are not exercised here (dropouts are identity at eval).
    H = W = window_size
    B, N, C = x.shape
    assert H * W == N, "input feature has wrong size"
    n_head = cfg["n_head"]
    n_group = cfg["n_group"]
    gc = C // n_group
    ngh = n_head // n_group
    stride = cfg["stride"]
    orf = cfg["offset_range_factor"]
    kk = cfg["kk"]

    # proj_q (1x1 conv) -> bf16 tokens (feeds offset net + attention kernel)
    q_flat = pointwise_linear(
        x.reshape(B * N, C), params["wqT"], params["bq"], out_dtype=jnp.bfloat16
    )
    q_bnc = q_flat.reshape(B, N, C)

    # ------------- offset network: depthwise conv -> LN -> GELU -> tiny 1x1 ------------
    q_grp = (
        q_bnc.reshape(B, H, W, n_group, gc)
        .transpose(0, 3, 1, 2, 4)
        .reshape(B * n_group, H, W, gc)
    )
    dw = lax.conv_general_dilated(
        q_grp,
        params["w_dw_hwio"],
        window_strides=(stride, stride),
        padding=[(kk // 2, kk // 2), (kk // 2, kk // 2)],
        dimension_numbers=("NHWC", "HWIO", "NHWC"),
        feature_group_count=gc,
        preferred_element_type=jnp.float32,
    ) + params["b_dw"].reshape(1, 1, 1, gc)
    Hk, Wk = dw.shape[1], dw.shape[2]
    n_sample = Hk * Wk

    mu = jnp.mean(dw, axis=-1, keepdims=True)  # channel LayerNorm (NHWC), f32
    var = jnp.mean((dw - mu) ** 2, axis=-1, keepdims=True)
    t = (dw - mu) / jnp.sqrt(var + 1e-5) * params["ln_g"] + params["ln_b"]
    t = jax.nn.gelu(t, approximate=False)
    # Cout=2 head: plain jnp dot (a Pallas kernel here would be lane-sparse overhead)
    offset = jnp.dot(t, params["w_offT"])  # (B*g, Hk, Wk, 2), channels = (dy, dx)

    if orf > 0 and not cfg["no_off"]:
        offset_range = jnp.array([1.0 / (Hk - 1), 1.0 / (Wk - 1)], jnp.float32)
        offset = jnp.tanh(offset) * offset_range * orf

    reference = get_ref_points(Hk, Wk, B, n_group, jnp.float32)
    if cfg["no_off"]:
        offset = jnp.zeros_like(offset)
    pos = offset + reference if orf >= 0 else jnp.clip(offset + reference, -1.0, 1.0)

    # ------------- deformable sampling (channels-last, f32) -------------
    x_grp = (
        x.reshape(B, H, W, n_group, gc)
        .transpose(0, 3, 1, 2, 4)
        .reshape(B * n_group, H, W, gc)
    )
    x_sampled = grid_sample_bilinear_nhwc(x_grp, pos[..., ::-1])  # (B*g, Hk, Wk, gc)
    xs_bnc = (
        x_sampled.reshape(B, n_group, n_sample, gc)
        .transpose(0, 2, 1, 3)
        .reshape(B, n_sample, C)
    )

    # proj_k / proj_v fused (scale folded into the k half); bf16 (B, n, 2C) kv slab
    kv = pointwise_linear(
        xs_bnc.reshape(B * n_sample, C), params["w_kvT"], params["b_kv"],
        out_dtype=jnp.bfloat16,
    ).reshape(B, n_sample, 2 * C)

    # ------------- relative position bias (continuous rpe table, bilinear sample) ------
    rpe = params["rpe_table"]  # (n_head, 2H-1, 2W-1)
    rpe_img = jnp.broadcast_to(
        rpe.reshape(n_group, ngh, 2 * H - 1, 2 * W - 1).transpose(0, 2, 3, 1)[None],
        (B, n_group, 2 * H - 1, 2 * W - 1, ngh),
    ).reshape(B * n_group, 2 * H - 1, 2 * W - 1, ngh)
    q_grid = get_ref_points(H, W, B, n_group, jnp.float32)
    disp = (
        q_grid.reshape(B * n_group, H * W, 2)[:, :, None, :]
        - pos.reshape(B * n_group, n_sample, 2)[:, None, :, :]
    ) * 0.5
    bias_gmn = grid_sample_bilinear_nhwc(rpe_img, disp[..., ::-1])  # (B*g, M, n, ngh)
    attn_bias = (
        bias_gmn.reshape(B, n_group, H * W, n_sample, ngh)
        .transpose(0, 1, 4, 2, 3)
        .reshape(B, n_head, H * W, n_sample)
        .astype(jnp.bfloat16)  # halve the largest attention-input stream
    )

    # ------------- attention core + fused proj_out (Pallas kernel) -------------
    y_bmc = deformable_attention_core(
        q_bnc, kv, attn_bias, params["woT"], params["bo"],
        n_head=n_head, out_dtype=x.dtype,
    )

    y = y_bmc.reshape(B, H, W, C).transpose(0, 3, 1, 2)  # NCHW to match the module

    return (
        y,
        pos.reshape(B, n_group, Hk, Wk, 2),
        reference.reshape(B, n_group, Hk, Wk, 2),
    )


# ---------------------------------------------------------------------------
# Deterministic parameter init (shapes from the module's __init__)
# ---------------------------------------------------------------------------
def init_params(key, dim, n_head, n_group, kk, q_h, q_w):
    gc = dim // n_group
    ks = jax.random.split(key, 12)

    def w(k, shape, std=0.05):
        return jax.random.normal(k, shape, jnp.float32) * std

    return dict(
        wq=w(ks[0], (dim, dim)), bq=w(ks[1], (dim,)),
        wk=w(ks[2], (dim, dim)), bk=w(ks[3], (dim,)),
        wv=w(ks[4], (dim, dim)), bv=w(ks[5], (dim,)),
        wo=w(ks[6], (dim, dim)), bo=w(ks[7], (dim,)),
        w_dw=w(ks[8], (gc, 1, kk, kk)), b_dw=w(ks[9], (gc,)),
        ln_g=jnp.ones((gc,), jnp.float32), ln_b=jnp.zeros((gc,), jnp.float32),
        w_off=w(ks[10], (2, gc)),
        rpe_table=jax.random.truncated_normal(
            ks[11], -2.0, 2.0, (n_head, 2 * q_h - 1, 2 * q_w - 1), jnp.float32
        )
        * 0.01,
    )


if __name__ == "__main__":
    # Small config: window 8x8 (kk=3), dim=32, 4 heads, 2 offset groups, stride 2 -> Hk=Wk=4.
    B, window, dim, n_head, n_group = 2, 8, 32, 4, 2
    stride, offset_range_factor, kk = 2, 2, 3
    H = W = window
    N = H * W

    key = jax.random.PRNGKey(0)
    kx, kp = jax.random.split(key)
    x = jax.random.normal(kx, (B, N, dim), jnp.float32)
    raw_params = init_params(kp, dim, n_head, n_group, kk, H, W)
    params = prepare_params(raw_params, n_head)  # one-time transpose/fuse/bf16 cast

    cfg = dict(
        n_head=n_head,
        n_group=n_group,
        stride=stride,
        offset_range_factor=offset_range_factor,
        kk=kk,
        no_off=False,
    )

    @jax.jit
    def run(p, inp):
        return dat_swin_d_attention_forward(p, inp, window, cfg)

    y, pos, ref = run(params, x)
    jax.block_until_ready((y, pos, ref))
    assert y.shape == (B, dim, H, W)
    assert pos.shape == (B, n_group, 4, 4, 2)
    assert ref.shape == (B, n_group, 4, 4, 2)
    assert bool(jnp.all(jnp.isfinite(y)))
    print("KERNEL_OK")
</pallas_src>

<mosaic_0001>
module attributes {stable_mosaic.version = 11 : i64} {
  func.func @_pointwise_linear_kernel(%arg0: i32, %arg1: memref<128x32xf32, #tpu.memory_space<vmem>>, %arg2: memref<32x32xbf16, #tpu.memory_space<vmem>>, %arg3: memref<1x32xf32, #tpu.memory_space<vmem>>, %arg4: memref<128x32xbf16, #tpu.memory_space<vmem>>) attributes {dimension_semantics = [#tpu.dimension_semantics<parallel>], iteration_bounds = array<i64: 1>, scalar_prefetch = 0 : i64, scratch_operands = 0 : i64, tpu.core_type = #tpu.core_type<tc>, window_params = [{transform_indices = @transform_0, window_bounds = array<i64: 128, 32>}, {pipeline_mode = #tpu.pipeline_mode<synchronous>, transform_indices = @transform_1, window_bounds = array<i64: 32, 32>}, {pipeline_mode = #tpu.pipeline_mode<synchronous>, transform_indices = @transform_2, window_bounds = array<i64: 1, 32>}, {transform_indices = @transform_3, window_bounds = array<i64: 128, 32>}]} {
    %c0 = arith.constant 0 : index
    %c0_0 = arith.constant 0 : index
    %0 = vector.load %arg1[%c0, %c0_0] : memref<128x32xf32, #tpu.memory_space<vmem>>, vector<128x32xf32>
    %1 = arith.truncf %0 : vector<128x32xf32> to vector<128x32xbf16>
    %c0_1 = arith.constant 0 : index
    %c0_2 = arith.constant 0 : index
    %2 = vector.load %arg2[%c0_1, %c0_2] : memref<32x32xbf16, #tpu.memory_space<vmem>>, vector<32x32xbf16>
    %cst = arith.constant dense<0.000000e+00> : vector<128x32xf32>
    %3 = tpu.matmul %1, %2, %cst {dimension_numbers = #tpu.dot_dimension_numbers<[1], [0], [0], [1], [0, 0, 1, 1], [], []>} : vector<128x32xbf16>, vector<32x32xbf16>, vector<128x32xf32> -> vector<128x32xf32>
    %c0_3 = arith.constant 0 : index
    %c0_4 = arith.constant 0 : index
    %4 = vector.load %arg3[%c0_3, %c0_4] : memref<1x32xf32, #tpu.memory_space<vmem>>, vector<1x32xf32>
    %5 = vector.broadcast %4 : vector<1x32xf32> to vector<128x32xf32>
    %6 = arith.addf %3, %5 : vector<128x32xf32>
    %7 = arith.truncf %6 : vector<128x32xf32> to vector<128x32xbf16>
    %c0_5 = arith.constant 0 : index
    %c0_6 = arith.constant 0 : index
    %8 = vector.load %arg4[%c0_5, %c0_6] : memref<128x32xbf16, #tpu.memory_space<vmem>>, vector<128x32xbf16>
    tpu.vector_store %arg4[%c0_5, %c0_6], %7 {strides = array<i32>} : memref<128x32xbf16, #tpu.memory_space<vmem>>, vector<128x32xbf16>,
    return
  }
  func.func @transform_0(%arg0: i32) -> (i32, i32) {
    %c0_i32 = arith.constant 0 : i32
    %c0_i32_0 = arith.constant 0 : i32
    return %arg0, %c0_i32 : i32, i32
  }
  func.func @transform_1(%arg0: i32) -> (i32, i32) {
    %c0_i32 = arith.constant 0 : i32
    %c0_i32_0 = arith.constant 0 : i32
    %c0_i32_1 = arith.constant 0 : i32
    return %c0_i32, %c0_i32_0 : i32, i32
  }
  func.func @transform_2(%arg0: i32) -> (i32, i32) {
    %c0_i32 = arith.constant 0 : i32
    %c0_i32_0 = arith.constant 0 : i32
    %c0_i32_1 = arith.constant 0 : i32
    return %c0_i32, %c0_i32_0 : i32, i32
  }
  func.func @transform_3(%arg0: i32) -> (i32, i32) {
    %c0_i32 = arith.constant 0 : i32
    %c0_i32_0 = arith.constant 0 : i32
    return %arg0, %c0_i32 : i32, i32
  }
}

module attributes {stable_mosaic.version = 11 : i64} {
  func.func @_pointwise_linear_kernel(%arg0: i32, %arg1: memref<32x32xf32, #tpu.memory_space<vmem>>, %arg2: memref<32x64xbf16, #tpu.memory_space<vmem>>, %arg3: memref<1x64xf32, #tpu.memory_space<vmem>>, %arg4: memref<32x64xbf16, #tpu.memory_space<vmem>>) attributes {dimension_semantics = [#tpu.dimension_semantics<parallel>], iteration_bounds = array<i64: 1>, scalar_prefetch = 0 : i64, scratch_operands = 0 : i64, tpu.core_type = #tpu.core_type<tc>, window_params = [{transform_indices = @transform_0, window_bounds = array<i64: 32, 32>}, {pipeline_mode = #tpu.pipeline_mode<synchronous>, transform_indices = @transform_1, window_bounds = array<i64: 32, 64>}, {pipeline_mode = #tpu.pipeline_mode<synchronous>, transform_indices = @transform_2, window_bounds = array<i64: 1, 64>}, {transform_indices = @transform_3, window_bounds = array<i64: 32, 64>}]} {
    %c0 = arith.constant 0 : index
    %c0_0 = arith.constant 0 : index
    %0 = vector.load %arg1[%c0, %c0_0] : memref<32x32xf32, #tpu.memory_space<vmem>>, vector<32x32xf32>
    %1 = arith.truncf %0 : vector<32x32xf32> to vector<32x32xbf16>
    %c0_1 = arith.constant 0 : index
    %c0_2 = arith.constant 0 : index
    %2 = vector.load %arg2[%c0_1, %c0_2] : memref<32x64xbf16, #tpu.memory_space<vmem>>, vector<32x64xbf16>
    %cst = arith.constant dense<0.000000e+00> : vector<32x64xf32>
    %3 = tpu.matmul %1, %2, %cst {dimension_numbers = #tpu.dot_dimension_numbers<[1], [0], [0], [1], [0, 0, 1, 1], [], []>} : vector<32x32xbf16>, vector<32x64xbf16>, vector<32x64xf32> -> vector<32x64xf32>
    %c0_3 = arith.constant 0 : index
    %c0_4 = arith.constant 0 : index
    %4 = vector.load %arg3[%c0_3, %c0_4] : memref<1x64xf32, #tpu.memory_space<vmem>>, vector<1x64xf32>
    %5 = vector.broadcast %4 : vector<1x64xf32> to vector<32x64xf32>
    %6 = arith.addf %3, %5 : vector<32x64xf32>
    %7 = arith.truncf %6 : vector<32x64xf32> to vector<32x64xbf16>
    %c0_5 = arith.constant 0 : index
    %c0_6 = arith.constant 0 : index
    %8 = vector.load %arg4[%c0_5, %c0_6] : memref<32x64xbf16, #tpu.memory_space<vmem>>, vector<32x64xbf16>
    tpu.vector_store %arg4[%c0_5, %c0_6], %7 {strides = array<i32>} : memref<32x64xbf16, #tpu.memory_space<vmem>>, vector<32x64xbf16>,
    return
  }
  func.func @transform_0(%arg0: i32) -> (i32, i32) {
    %c0_i32 = arith.constant 0 : i32
    %c0_i32_0 = arith.constant 0 : i32
    return %arg0, %c0_i32 : i32, i32
  }
  func.func @transform_1(%arg0: i32) -> (i32, i32) {
    %c0_i32 = arith.constant 0 : i32
    %c0_i32_0 = arith.constant 0 : i32
    %c0_i32_1 = arith.constant 0 : i32
    return %c0_i32, %c0_i32_0 : i32, i32
  }
  func.func @transform_2(%arg0: i32) -> (i32, i32) {
    %c0_i32 = arith.constant 0 : i32
    %c0_i32_0 = arith.constant 0 : i32
    %c0_i32_1 = arith.constant 0 : i32
    return %c0_i32, %c0_i32_0 : i32, i32
  }
  func.func @transform_3(%arg0: i32) -> (i32, i32) {
    %c0_i32 = arith.constant 0 : i32
    %c0_i32_0 = arith.constant 0 : i32
    return %arg0, %c0_i32 : i32, i32
  }
}

module attributes {stable_mosaic.version = 11 : i64} {
  func.func @_attention_kernel(%arg0: i32, %arg1: memref<1x64x32xbf16, #tpu.memory_space<vmem>>, %arg2: memref<1x16x64xbf16, #tpu.memory_space<vmem>>, %arg3: memref<1x4x64x16xbf16, #tpu.memory_space<vmem>>, %arg4: memref<32x32xbf16, #tpu.memory_space<vmem>>, %arg5: memref<1x32xf32, #tpu.memory_space<vmem>>, %arg6: memref<1x64x32xf32, #tpu.memory_space<vmem>>, %arg7: memref<1x64x32xbf16, #tpu.memory_space<vmem>>) attributes {dimension_semantics = [#tpu.dimension_semantics<parallel>], iteration_bounds = array<i64: 2>, scalar_prefetch = 0 : i64, scratch_operands = 1 : i64, tpu.core_type = #tpu.core_type<tc>, window_params = [{transform_indices = @transform_0, window_bounds = array<i64: 1, 64, 32>}, {transform_indices = @transform_1, window_bounds = array<i64: 1, 16, 64>}, {transform_indices = @transform_2, window_bounds = array<i64: 1, 4, 64, 16>}, {pipeline_mode = #tpu.pipeline_mode<synchronous>, transform_indices = @transform_3, window_bounds = array<i64: 32, 32>}, {pipeline_mode = #tpu.pipeline_mode<synchronous>, transform_indices = @transform_4, window_bounds = array<i64: 1, 32>}, {transform_indices = @transform_5, window_bounds = array<i64: 1, 64, 32>}]} {
    %c0 = arith.constant 0 : index
    %c0_0 = arith.constant 0 : index
    %c0_1 = arith.constant 0 : index
    %0 = vector.load %arg1[%c0, %c0_0, %c0_1] : memref<1x64x32xbf16, #tpu.memory_space<vmem>>, vector<1x64x32xbf16>
    %c0_2 = arith.constant 0 : index
    %c0_3 = arith.constant 0 : index
    %c0_4 = arith.constant 0 : index
    %1 = vector.load %arg2[%c0_2, %c0_3, %c0_4] : memref<1x16x64xbf16, #tpu.memory_space<vmem>>, vector<1x16x64xbf16>
    %c0_5 = arith.constant 0 : index
    %c0_6 = arith.constant 0 : index
    %c0_7 = arith.constant 0 : index
    %c0_8 = arith.constant 0 : index
    %2 = vector.load %arg3[%c0_5, %c0_6, %c0_7, %c0_8] : memref<1x4x64x16xbf16, #tpu.memory_space<vmem>>, vector<1x4x64x16xbf16>
    %3 = vector.extract_strided_slice %0 {offsets = [0, 0, 0], sizes = [1, 64, 8], strides = [1, 1, 1]} : vector<1x64x32xbf16> to vector<1x64x8xbf16>
    %4 = vector.extract_strided_slice %1 {offsets = [0, 0, 0], sizes = [1, 16, 8], strides = [1, 1, 1]} : vector<1x16x64xbf16> to vector<1x16x8xbf16>
    %5 = vector.extract_strided_slice %1 {offsets = [0, 0, 32], sizes = [1, 16, 8], strides = [1, 1, 1]} : vector<1x16x64xbf16> to vector<1x16x8xbf16>
    "tpu.trace_start"() <{level = 10 : i32, message = "bmd,bnd->bmn"}> : () -> ()
    %cst = arith.constant dense<0.000000e+00> : vector<1x64x16xf32>
    %6 = tpu.matmul %3, %4, %cst {dimension_numbers = #tpu.dot_dimension_numbers<[2], [2], [1], [1], [0, 0, 0, 1, 1, 1], [0], [0]>} : vector<1x64x8xbf16>, vector<1x16x8xbf16>, vector<1x64x16xf32> -> vector<1x64x16xf32>
    "tpu.trace_stop"() : () -> ()
    %7 = vector.extract_strided_slice %2 {offsets = [0, 0, 0, 0], sizes = [1, 1, 64, 16], strides = [1, 1, 1, 1]} : vector<1x4x64x16xbf16> to vector<1x1x64x16xbf16>
    %8 = vector.shape_cast %7 : vector<1x1x64x16xbf16> to vector<1x64x16xbf16>
    %9 = arith.extf %8 : vector<1x64x16xbf16> to vector<1x64x16xf32>
    %10 = arith.addf %6, %9 : vector<1x64x16xf32>
    %cst_9 = arith.constant dense<0xFF800000> : vector<1x64xf32>
    %11 = vector.multi_reduction <maximumf>, %10, %cst_9 [2] : vector<1x64x16xf32> to vector<1x64xf32>
    %12 = vector.shape_cast %11 : vector<1x64xf32> to vector<1x64x1xf32>
    %13 = vector.broadcast %12 : vector<1x64x1xf32> to vector<1x64x16xf32>
    %14 = arith.subf %10, %13 : vector<1x64x16xf32>
    %15 = math.exp %14 : vector<1x64x16xf32>
    %cst_10 = arith.constant dense<0.000000e+00> : vector<1x64xf32>
    %16 = vector.multi_reduction <add>, %15, %cst_10 [2] : vector<1x64x16xf32> to vector<1x64xf32>
    %17 = vector.shape_cast %16 : vector<1x64xf32> to vector<1x64x1xf32>
    %18 = arith.truncf %15 : vector<1x64x16xf32> to vector<1x64x16xbf16>
    "tpu.trace_start"() <{level = 10 : i32, message = "bmn,bnd->bmd"}> : () -> ()
    %cst_11 = arith.constant dense<0.000000e+00> : vector<1x64x8xf32>
    %19 = tpu.matmul %18, %5, %cst_11 {dimension_numbers = #tpu.dot_dimension_numbers<[2], [1], [1], [2], [0, 0, 0, 1, 1, 2], [0], [0]>} : vector<1x64x16xbf16>, vector<1x16x8xbf16>, vector<1x64x8xf32> -> vector<1x64x8xf32>
    "tpu.trace_stop"() : () -> ()
    %20 = tpu.reciprocal %17 {approx = true} : vector<1x64x1xf32> -> vector<1x64x1xf32>
    %21 = vector.broadcast %20 : vector<1x64x1xf32> to vector<1x64x8xf32>
    %22 = arith.mulf %19, %21 : vector<1x64x8xf32>
    %23 = arith.truncf %22 : vector<1x64x8xf32> to vector<1x64x8xbf16>
    %c0_12 = arith.constant 0 : index
    %c0_13 = arith.constant 0 : index
    %c0_14 = arith.constant 0 : index
    %24 = vector.load %arg7[%c0_12, %c0_13, %c0_14] : memref<1x64x32xbf16, #tpu.memory_space<vmem>>, vector<1x64x8xbf16>
    tpu.vector_store %arg7[%c0_12, %c0_13, %c0_14], %23 {strides = array<i32>} : memref<1x64x32xbf16, #tpu.memory_space<vmem>>, vector<1x64x8xbf16>,
    %25 = vector.extract_strided_slice %0 {offsets = [0, 0, 8], sizes = [1, 64, 8], strides = [1, 1, 1]} : vector<1x64x32xbf16> to vector<1x64x8xbf16>
    %26 = vector.extract_strided_slice %1 {offsets = [0, 0, 8], sizes = [1, 16, 8], strides = [1, 1, 1]} : vector<1x16x64xbf16> to vector<1x16x8xbf16>
    %27 = vector.extract_strided_slice %1 {offsets = [0, 0, 40], sizes = [1, 16, 8], strides = [1, 1, 1]} : vector<1x16x64xbf16> to vector<1x16x8xbf16>
    "tpu.trace_start"() <{level = 10 : i32, message = "bmd,bnd->bmn"}> : () -> ()
    %cst_15 = arith.constant dense<0.000000e+00> : vector<1x64x16xf32>
    %28 = tpu.matmul %25, %26, %cst_15 {dimension_numbers = #tpu.dot_dimension_numbers<[2], [2], [1], [1], [0, 0, 0, 1, 1, 1], [0], [0]>} : vector<1x64x8xbf16>, vector<1x16x8xbf16>, vector<1x64x16xf32> -> vector<1x64x16xf32>
    "tpu.trace_stop"() : () -> ()
    %29 = vector.extract_strided_slice %2 {offsets = [0, 1, 0, 0], sizes = [1, 1, 64, 16], strides = [1, 1, 1, 1]} : vector<1x4x64x16xbf16> to vector<1x1x64x16xbf16>
    %30 = vector.shape_cast %29 : vector<1x1x64x16xbf16> to vector<1x64x16xbf16>
    %31 = arith.extf %30 : vector<1x64x16xbf16> to vector<1x64x16xf32>
    %32 = arith.addf %28, %31 : vector<1x64x16xf32>
    %cst_16 = arith.constant dense<0xFF800000> : vector<1x64xf32>
    %33 = vector.multi_reduction <maximumf>, %32, %cst_16 [2] : vector<1x64x16xf32> to vector<1x64xf32>
    %34 = vector.shape_cast %33 : vector<1x64xf32> to vector<1x64x1xf32>
    %35 = vector.broadcast %34 : vector<1x64x1xf32> to vector<1x64x16xf32>
    %36 = arith.subf %32, %35 : vector<1x64x16xf32>
    %37 = math.exp %36 : vector<1x64x16xf32>
    %cst_17 = arith.constant dense<0.000000e+00> : vector<1x64xf32>
    %38 = vector.multi_reduction <add>, %37, %cst_17 [2] : vector<1x64x16xf32> to vector<1x64xf32>
    %39 = vector.shape_cast %38 : vector<1x64xf32> to vector<1x64x1xf32>
    %40 = arith.truncf %37 : vector<1x64x16xf32> to vector<1x64x16xbf16>
    "tpu.trace_start"() <{level = 10 : i32, message = "bmn,bnd->bmd"}> : () -> ()
    %cst_18 = arith.constant dense<0.000000e+00> : vector<1x64x8xf32>
    %41 = tpu.matmul %40, %27, %cst_18 {dimension_numbers = #tpu.dot_dimension_numbers<[2], [1], [1], [2], [0, 0, 0, 1, 1, 2], [0], [0]>} : vector<1x64x16xbf16>, vector<1x16x8xbf16>, vector<1x64x8xf32> -> vector<1x64x8xf32>
    "tpu.trace_stop"() : () -> ()
    %42 = tpu.reciprocal %39 {approx = true} : vector<1x64x1xf32> -> vector<1x64x1xf32>
    %43 = vector.broadcast %42 : vector<1x64x1xf32> to vector<1x64x8xf32>
    %44 = arith.mulf %41, %43 : vector<1x64x8xf32>
    %45 = arith.truncf %44 : vector<1x64x8xf32> to vector<1x64x8xbf16>
    %c0_19 = arith.constant 0 : index
    %c0_20 = arith.constant 0 : index
    %c8 = arith.constant 8 : index
    %46 = vector.load %arg7[%c0_19, %c0_20, %c8] : memref<1x64x32xbf16, #tpu.memory_space<vmem>>, vector<1x64x8xbf16>
    tpu.vector_store %arg7[%c0_19, %c0_20, %c8], %45 {strides = array<i32>} : memref<1x64x32xbf16, #tpu.memory_space<vmem>>, vector<1x64x8xbf16>,
    %47 = vector.extract_strided_slice %0 {offsets = [0, 0, 16], sizes = [1, 64, 8], strides = [1, 1, 1]} : vector<1x64x32xbf16> to vector<1x64x8xbf16>
    %48 = vector.extract_strided_slice %1 {offsets = [0, 0, 16], sizes = [1, 16, 8], strides = [1, 1, 1]} : vector<1x16x64xbf16> to vector<1x16x8xbf16>
    %49 = vector.extract_strided_slice %1 {offsets = [0, 0, 48], sizes = [1, 16, 8], strides = [1, 1, 1]} : vector<1x16x64xbf16> to vector<1x16x8xbf16>
    "tpu.trace_start"() <{level = 10 : i32, message = "bmd,bnd->bmn"}> : () -> ()
    %cst_21 = arith.constant dense<0.000000e+00> : vector<1x64x16xf32>
    %50 = tpu.matmul %47, %48, %cst_21 {dimension_numbers = #tpu.dot_dimension_numbers<[2], [2], [1], [1], [0, 0, 0, 1, 1, 1], [0], [0]>} : vector<1x64x8xbf16>, vector<1x16x8xbf16>, vector<1x64x16xf32> -> vector<1x64x16xf32>
    "tpu.trace_stop"() : () -> ()
    %51 = vector.extract_strided_slice %2 {offsets = [0, 2, 0, 0], sizes = [1, 1, 64, 16], strides = [1, 1, 1, 1]} : vector<1x4x64x16xbf16> to vector<1x1x64x16xbf16>
    %52 = vector.shape_cast %51 : vector<1x1x64x16xbf16> to vector<1x64x16xbf16>
    %53 = arith.extf %52 : vector<1x64x16xbf16> to vector<1x64x16xf32>
    %54 = arith.addf %50, %53 : vector<1x64x16xf32>
    %cst_22 = arith.constant dense<0xFF800000> : vector<1x64xf32>
    %55 = vector.multi_reduction <maximumf>, %54, %cst_22 [2] : vector<1x64x16xf32> to vector<1x64xf32>
    %56 = vector.shape_cast %55 : vector<1x64xf32> to vector<1x64x1xf32>
    %57 = vector.broadcast %56 : vector<1x64x1xf32> to vector<1x64x16xf32>
    %58 = arith.subf %54, %57 : vector<1x64x16xf32>
    %59 = math.exp %58 : vector<1x64x16xf32>
    %cst_23 = arith.constant dense<0.000000e+00> : vector<1x64xf32>
    %60 = vector.multi_reduction <add>, %59, %cst_23 [2] : vector<1x64x16xf32> to vector<1x64xf32>
    %61 = vector.shape_cast %60 : vector<1x64xf32> to vector<1x64x1xf32>
    %62 = arith.truncf %59 : vector<1x64x16xf32> to vector<1x64x16xbf16>
    "tpu.trace_start"() <{level = 10 : i32, message = "bmn,bnd->bmd"}> : () -> ()
    %cst_24 = arith.constant dense<0.000000e+00> : vector<1x64x8xf32>
    %63 = tpu.matmul %62, %49, %cst_24 {dimension_numbers = #tpu.dot_dimension_numbers<[2], [1], [1], [2], [0, 0, 0, 1, 1, 2], [0], [0]>} : vector<1x64x16xbf16>, vector<1x16x8xbf16>, vector<1x64x8xf32> -> vector<1x64x8xf32>
    "tpu.trace_stop"() : () -> ()
    %64 = tpu.reciprocal %61 {approx = true} : vector<1x64x1xf32> -> vector<1x64x1xf32>
    %65 = vector.broadcast %64 : vector<1x64x1xf32> to vector<1x64x8xf32>
    %66 = arith.mulf %63, %65 : vector<1x64x8xf32>
    %67 = arith.truncf %66 : vector<1x64x8xf32> to vector<1x64x8xbf16>
    %c0_25 = arith.constant 0 : index
    %c0_26 = arith.constant 0 : index
    %c16 = arith.constant 16 : index
    %68 = vector.load %arg7[%c0_25, %c0_26, %c16] : memref<1x64x32xbf16, #tpu.memory_space<vmem>>, vector<1x64x8xbf16>
    tpu.vector_store %arg7[%c0_25, %c0_26, %c16], %67 {strides = array<i32>} : memref<1x64x32xbf16, #tpu.memory_space<vmem>>, vector<1x64x8xbf16>,
    %69 = vector.extract_strided_slice %0 {offsets = [0, 0, 24], sizes = [1, 64, 8], strides = [1, 1, 1]} : vector<1x64x32xbf16> to vector<1x64x8xbf16>
    %70 = vector.extract_strided_slice %1 {offsets = [0, 0, 24], sizes = [1, 16, 8], strides = [1, 1, 1]} : vector<1x16x64xbf16> to vector<1x16x8xbf16>
    %71 = vector.extract_strided_slice %1 {offsets = [0, 0, 56], sizes = [1, 16, 8], strides = [1, 1, 1]} : vector<1x16x64xbf16> to vector<1x16x8xbf16>
    "tpu.trace_start"() <{level = 10 : i32, message = "bmd,bnd->bmn"}> : () -> ()
    %cst_27 = arith.constant dense<0.000000e+00> : vector<1x64x16xf32>
    %72 = tpu.matmul %69, %70, %cst_27 {dimension_numbers = #tpu.dot_dimension_numbers<[2], [2], [1], [1], [0, 0, 0, 1, 1, 1], [0], [0]>} : vector<1x64x8xbf16>, vector<1x16x8xbf16>, vector<1x64x16xf32> -> vector<1x64x16xf32>
    "tpu.trace_stop"() : () -> ()
    %73 = vector.extract_strided_slice %2 {offsets = [0, 3, 0, 0], sizes = [1, 1, 64, 16], strides = [1, 1, 1, 1]} : vector<1x4x64x16xbf16> to vector<1x1x64x16xbf16>
    %74 = vector.shape_cast %73 : vector<1x1x64x16xbf16> to vector<1x64x16xbf16>
    %75 = arith.extf %74 : vector<1x64x16xbf16> to vector<1x64x16xf32>
    %76 = arith.addf %72, %75 : vector<1x64x16xf32>
    %cst_28 = arith.constant dense<0xFF800000> : vector<1x64xf32>
    %77 = vector.multi_reduction <maximumf>, %76, %cst_28 [2] : vector<1x64x16xf32> to vector<1x64xf32>
    %78 = vector.shape_cast %77 : vector<1x64xf32> to vector<1x64x1xf32>
    %79 = vector.broadcast %78 : vector<1x64x1xf32> to vector<1x64x16xf32>
    %80 = arith.subf %76, %79 : vector<1x64x16xf32>
    %81 = math.exp %80 : vector<1x64x16xf32>
    %cst_29 = arith.constant dense<0.000000e+00> : vector<1x64xf32>
    %82 = vector.multi_reduction <add>, %81, %cst_29 [2] : vector<1x64x16xf32> to vector<1x64xf32>
    %83 = vector.shape_cast %82 : vector<1x64xf32> to vector<1x64x1xf32>
    %84 = arith.truncf %81 : vector<1x64x16xf32> to vector<1x64x16xbf16>
    "tpu.trace_start"() <{level = 10 : i32, message = "bmn,bnd->bmd"}> : () -> ()
    %cst_30 = arith.constant dense<0.000000e+00> : vector<1x64x8xf32>
    %85 = tpu.matmul %84, %71, %cst_30 {dimension_numbers = #tpu.dot_dimension_numbers<[2], [1], [1], [2], [0, 0, 0, 1, 1, 2], [0], [0]>} : vector<1x64x16xbf16>, vector<1x16x8xbf16>, vector<1x64x8xf32> -> vector<1x64x8xf32>
    "tpu.trace_stop"() : () -> ()
    %86 = tpu.reciprocal %83 {approx = true} : vector<1x64x1xf32> -> vector<1x64x1xf32>
    %87 = vector.broadcast %86 : vector<1x64x1xf32> to vector<1x64x8xf32>
    %88 = arith.mulf %85, %87 : vector<1x64x8xf32>
    %89 = arith.truncf %88 : vector<1x64x8xf32> to vector<1x64x8xbf16>
    %c0_31 = arith.constant 0 : index
    %c0_32 = arith.constant 0 : index
    %c24 = arith.constant 24 : index
    %90 = vector.load %arg7[%c0_31, %c0_32, %c24] : memref<1x64x32xbf16, #tpu.memory_space<vmem>>, vector<1x64x8xbf16>
    tpu.vector_store %arg7[%c0_31, %c0_32, %c24], %89 {strides = array<i32>} : memref<1x64x32xbf16, #tpu.memory_space<vmem>>, vector<1x64x8xbf16>,
    %c0_33 = arith.constant 0 : index
    %c0_34 = arith.constant 0 : index
    %c0_35 = arith.constant 0 : index
    %91 = vector.load %arg7[%c0_33, %c0_34, %c0_35] : memref<1x64x32xbf16, #tpu.memory_space<vmem>>, vector<1x64x32xbf16>
    %92 = vector.shape_cast %91 : vector<1x64x32xbf16> to vector<64x32xbf16>
    %c0_36 = arith.constant 0 : index
    %c0_37 = arith.constant 0 : index
    %93 = vector.load %arg4[%c0_36, %c0_37] : memref<32x32xbf16, #tpu.memory_space<vmem>>, vector<32x32xbf16>
    %cst_38 = arith.constant dense<0.000000e+00> : vector<64x32xf32>
    %94 = tpu.matmul %92, %93, %cst_38 {dimension_numbers = #tpu.dot_dimension_numbers<[1], [0], [0], [1], [0, 0, 1, 1], [], []>} : vector<64x32xbf16>, vector<32x32xbf16>, vector<64x32xf32> -> vector<64x32xf32>
    %c0_39 = arith.constant 0 : index
    %c0_40 = arith.constant 0 : index
    %95 = vector.load %arg5[%c0_39, %c0_40] : memref<1x32xf32, #tpu.memory_space<vmem>>, vector<1x32xf32>
    %96 = vector.broadcast %95 : vector<1x32xf32> to vector<64x32xf32>
    %97 = arith.addf %94, %96 : vector<64x32xf32>
    %98 = vector.shape_cast %97 : vector<64x32xf32> to vector<1x64x32xf32>
    %c0_41 = arith.constant 0 : index
    %c0_42 = arith.constant 0 : index
    %c0_43 = arith.constant 0 : index
    %99 = vector.load %arg6[%c0_41, %c0_42, %c0_43] : memref<1x64x32xf32, #tpu.memory_space<vmem>>, vector<1x64x32xf32>
    tpu.vector_store %arg6[%c0_41, %c0_42, %c0_43], %98 {strides = array<i32>} : memref<1x64x32xf32, #tpu.memory_space<vmem>>, vector<1x64x32xf32>,
    return
  }
  func.func @transform_0(%arg0: i32) -> (i32, i32, i32) {
    %c0_i32 = arith.constant 0 : i32
    %c0_i32_0 = arith.constant 0 : i32
    %c0_i32_1 = arith.constant 0 : i32
    return %arg0, %c0_i32, %c0_i32_0 : i32, i32, i32
  }
  func.func @transform_1(%arg0: i32) -> (i32, i32, i32) {
    %c0_i32 = arith.constant 0 : i32
    %c0_i32_0 = arith.constant 0 : i32
    %c0_i32_1 = arith.constant 0 : i32
    return %arg0, %c0_i32, %c0_i32_0 : i32, i32, i32
  }
  func.func @transform_2(%arg0: i32) -> (i32, i32, i32, i32) {
    %c0_i32 = arith.constant 0 : i32
    %c0_i32_0 = arith.constant 0 : i32
    %c0_i32_1 = arith.constant 0 : i32
    %c0_i32_2 = arith.constant 0 : i32
    return %arg0, %c0_i32, %c0_i32_0, %c0_i32_1 : i32, i32, i32, i32
  }
  func.func @transform_3(%arg0: i32) -> (i32, i32) {
    %c0_i32 = arith.constant 0 : i32
    %c0_i32_0 = arith.constant 0 : i32
    %c0_i32_1 = arith.constant 0 : i32
    return %c0_i32, %c0_i32_0 : i32, i32
  }
  func.func @transform_4(%arg0: i32) -> (i32, i32) {
    %c0_i32 = arith.constant 0 : i32
    %c0_i32_0 = arith.constant 0 : i32
    %c0_i32_1 = arith.constant 0 : i32
    return %c0_i32, %c0_i32_0 : i32, i32
  }
  func.func @transform_5(%arg0: i32) -> (i32, i32, i32) {
    %c0_i32 = arith.constant 0 : i32
    %c0_i32_0 = arith.constant 0 : i32
    %c0_i32_1 = arith.constant 0 : i32
    return %arg0, %c0_i32, %c0_i32_0 : i32, i32, i32
  }
}

</mosaic_0001>

<bundles_post_ra>
// kernel: run.3
= control target key start
LH: loop header
LB: loop body
LE: loop exit
PB: predicated region body
PF: predicated region fallthrough
CT: control target
= control target key end

     0   :  { %8 = vsyncpa [#allocation3], 0  ;;  %s433_s0 = inlined_call_operand.vmem [shape: f32[128,32], index: 0, kind: input, shape index: {}]   ;;  %s434_s1 = inlined_call_operand.hbm [shape: bf16[32,32], index: 1, kind: input, shape index: {}]   ;;  %s435_s2 = inlined_call_operand.hbm [shape: f32[1,32], index: 2, kind: input, shape index: {}]   ;;  %s436_s3 = inlined_call_operand.vmem [shape: bf16[128,32], index: 3, kind: output, shape index: {}]  }
   0x1   :  { %s16_s14 = sshll.u32 %s434_s1, 4  ;;  %s17_s14 = int_to_ptr.hbm [resolvable:$true] %s16_s14 }
   0x2   :  { %9 = vsyncpa [#allocation5], 0  ;;  %s283_s15 = smov [#allocation2]   ;;  %s30_s19 = sshll.u32 %s435_s2, 4  ;;  %s31_s19 = int_to_ptr.hbm [resolvable:$true] %s30_s19 }
   0x3   :  { %s18_s16 = sshll.u32 %s283_s15, 4  ;;  %s284_s20 = smov 64   ;;  %s19_s16 = int_to_ptr.vmem [resolvable:$true] %s18_s16 }
   0x4   :  { %s285_s21 = smov 4   ;;  %s286_s22 = smov [#allocation4]  }
   0x5   :  { %24 = dma.hbm_to_vmem [thread:$0]  %s17_s14, 256, %s19_s16, [#allocation3], %s284_s20, %s284_s20, %s285_s21  }
   0x6   :  { %s32_s23 = sshll.u32 %s286_s22, 4  ;;  %s33_s23 = int_to_ptr.vmem [resolvable:$true] %s32_s23 }
   0x7   :  { %35 = dma.hbm_to_vmem [thread:$0]  %s31_s19, 16, %s33_s23, [#allocation5]  }
   0x8   :  { %279 = dma.done.wait [#allocation3], 256  }
   0x9   :  { %280 = vsyncadd [#allocation3], 4294967040 }
   0xa   :  { %281 = dma.done.wait [#allocation5], 16  }
   0xb   :  { %282 = vsyncadd [#allocation5], 4294967280  ;;  %v219_v0 = vld [vmem:[#allocation2 + $0x8] sm:$0xff]  ;;  %v218_v1 = vld [vmem:[#allocation2] sm:$0xff]  ;;  %vm89_vm0 = vcmask 261120   ;;  %vm179_vm1 = vcmask 257024  }
   0xc   :  { %v45_v2 = vld [vmem:[%s433_s0] sm:$0xff]  ;;  %v46_v3 = vld [vmem:[%s433_s0 + $0x8] sm:$0xff]  ;;  %120 = vmatpush.bf16.msra.mxu0 %v219_v0  ;;  %220 = vmatpush.bf16.msra.mxu1 %v219_v0  ;;  %v47_v14 = vld [vmem:[%s433_s0 + $0x10] sm:$0xff] }
   0xd   :  { %v49_v4 = vld [vmem:[%s433_s0 + $0x20] sm:$0xff]  ;;  %v50_v5 = vld [vmem:[%s433_s0 + $0x28] sm:$0xff]  ;;  %221 = vmatpush.bf16.msra.mxu2 %v219_v0  ;;  %222 = vmatpush.bf16.msra.mxu3 %v219_v0  ;;  %v61_v10 = vpack.c.bf16 %v46_v3, %v45_v2  ;;  %v48_v15 = vld [vmem:[%s433_s0 + $0x18] sm:$0xff] }
   0xe   :  { %v53_v6 = vld [vmem:[%s433_s0 + $0x40] sm:$0xff]  ;;  %v54_v7 = vld [vmem:[%s433_s0 + $0x48] sm:$0xff]  ;;  %v63_v11 = vpack.c.bf16 %v50_v5, %v49_v4  ;;  %v51_v16 = vld [vmem:[%s433_s0 + $0x30] sm:$0xff]  ;;  %v62_v22 = vpack.c.bf16 %v48_v15, %v47_v14 }
   0xf   :  { %v57_v8 = vld [vmem:[%s433_s0 + $0x60] sm:$0xff]  ;;  %v58_v9 = vld [vmem:[%s433_s0 + $0x68] sm:$0xff]  ;;  %v65_v12 = vpack.c.bf16 %v54_v7, %v53_v6  ;;  %v52_v17 = vld [vmem:[%s433_s0 + $0x38] sm:$0xff] }
  0x10   :  { %121 = vmatpush.bf16.msra.mxu0 %v218_v1  ;;  %223 = vmatpush.bf16.msra.mxu1 %v218_v1  ;;  %v67_v13 = vpack.c.bf16 %v58_v9, %v57_v8  ;;  %v55_v18 = vld [vmem:[%s433_s0 + $0x50] sm:$0xff]  ;;  %v56_v19 = vld [vmem:[%s433_s0 + $0x58] sm:$0xff]  ;;  %v64_v23 = vpack.c.bf16 %v52_v17, %v51_v16 }
  0x11   :  { %224 = vmatpush.bf16.msra.mxu2 %v218_v1  ;;  %225 = vmatpush.bf16.msra.mxu3 %v218_v1  ;;  %v59_v20 = vld [vmem:[%s433_s0 + $0x70] sm:$0xff]  ;;  %v60_v21 = vld [vmem:[%s433_s0 + $0x78] sm:$0xff]  ;;  %v66_v24 = vpack.c.bf16 %v56_v19, %v55_v18 }
  0x12   :  { %v68_v25 = vpack.c.bf16 %v60_v21, %v59_v20  ;;  %v230_v26 = vld [vmem:[#allocation4] ss:$0 sm:$0xff] }
  0x13   :  { %210 = vmatmul.msk.bf16.vlgmr.msra.gmra.mxu0 %vm89_vm0, %v61_v10  ;;  %212 = vmatmul.msk.bf16.vlgmr.msra.gmra.mxu1 %vm89_vm0, %v63_v11 }
  0x14   :  { %214 = vmatmul.msk.bf16.vlgmr.msra.gmra.mxu2 %vm89_vm0, %v65_v12  ;;  %216 = vmatmul.msk.bf16.vlgmr.msra.gmra.mxu3 %vm89_vm0, %v67_v13 }
  0x23   :  { %211 = vmatmul.msk.bf16.gmra.mxu0 %vm89_vm0, %v62_v22  ;;  %213 = vmatmul.msk.bf16.gmra.mxu1 %vm89_vm0, %v64_v23 }
  0x24   :  { %215 = vmatmul.msk.bf16.gmra.mxu2 %vm89_vm0, %v66_v24  ;;  %217 = vmatmul.msk.bf16.gmra.mxu3 %vm89_vm0, %v68_v25 }
  0x90   :  { %v123_v27 = vpop.f32.mrf.mxu0  ;;  %v133_v28 = vpop.f32.mrf.mxu1 }
  0x91   :  { %v124_v29 = vadd.f32 %v230_v26, %v123_v27  ;;  %v134_v30 = vadd.f32 %v230_v26, %v133_v28 }
  0x93   :  { %v163_v31 = vpack.c.bf16 %v124_v29, %v124_v29  ;;  %v167_v32 = vpack.c.bf16 %v134_v30, %v134_v30 }
  0x95   :  { %180 = vst.msk [vmem:[%s436_s3] sm:$0xf] %vm179_vm1, %v163_v31 }
  0x96   :  { %184 = vst.msk [vmem:[%s436_s3 + $0x10] sm:$0xf] %vm179_vm1, %v167_v32 }
  0x97   :  { %v143_v33 = vpop.f32.mrf.mxu2  ;;  %v153_v34 = vpop.f32.mrf.mxu3 }
  0x98   :  { %v144_v35 = vadd.f32 %v230_v26, %v143_v33  ;;  %v154_v36 = vadd.f32 %v230_v26, %v153_v34  ;;  %v125_v37 = vpop.f32.mrf.mxu0  ;;  %v135_v38 = vpop.f32.mrf.mxu1 }
  0x99   :  { %v126_v39 = vadd.f32 %v230_v26, %v125_v37  ;;  %v136_v40 = vadd.f32 %v230_v26, %v135_v38 }
  0x9a   :  { %v171_v41 = vpack.c.bf16 %v144_v35, %v144_v35  ;;  %v175_v42 = vpack.c.bf16 %v154_v36, %v154_v36 }
  0x9b   :  { %v164_v43 = vpack.c.bf16 %v126_v39, %v126_v39  ;;  %v168_v44 = vpack.c.bf16 %v136_v40, %v136_v40 }
  0x9c   :  { %188 = vst.msk [vmem:[%s436_s3 + $0x20] sm:$0xf] %vm179_vm1, %v171_v41 }
  0x9d   :  { %192 = vst.msk [vmem:[%s436_s3 + $0x30] sm:$0xf] %vm179_vm1, %v175_v42 }
  0x9e   :  { %181 = vst.msk [vmem:[%s436_s3 + $0x4] sm:$0xf] %vm179_vm1, %v164_v43 }
  0x9f   :  { %185 = vst.msk [vmem:[%s436_s3 + $0x14] sm:$0xf] %vm179_vm1, %v168_v44  ;;  %v145_v45 = vpop.f32.mrf.mxu2  ;;  %v155_v46 = vpop.f32.mrf.mxu3 }
  0xa0   :  { %v146_v47 = vadd.f32 %v230_v26, %v145_v45  ;;  %v156_v48 = vadd.f32 %v230_v26, %v155_v46  ;;  %v128_v49 = vpop.f32.mrf.mxu0  ;;  %v138_v50 = vpop.f32.mrf.mxu1 }
  0xa1   :  { %v129_v51 = vadd.f32 %v230_v26, %v128_v49  ;;  %v139_v52 = vadd.f32 %v230_v26, %v138_v50 }
  0xa2   :  { %v172_v53 = vpack.c.bf16 %v146_v47, %v146_v47  ;;  %v176_v54 = vpack.c.bf16 %v156_v48, %v156_v48 }
  0xa3   :  { %v165_v55 = vpack.c.bf16 %v129_v51, %v129_v51  ;;  %v169_v56 = vpack.c.bf16 %v139_v52, %v139_v52 }
  0xa4   :  { %189 = vst.msk [vmem:[%s436_s3 + $0x24] sm:$0xf] %vm179_vm1, %v172_v53 }
  0xa5   :  { %193 = vst.msk [vmem:[%s436_s3 + $0x34] sm:$0xf] %vm179_vm1, %v176_v54 }
  0xa6   :  { %182 = vst.msk [vmem:[%s436_s3 + $0x8] sm:$0xf] %vm179_vm1, %v165_v55 }
  0xa7   :  { %186 = vst.msk [vmem:[%s436_s3 + $0x18] sm:$0xf] %vm179_vm1, %v169_v56  ;;  %v148_v57 = vpop.f32.mrf.mxu2  ;;  %v158_v58 = vpop.f32.mrf.mxu3 }
  0xa8   :  { %v149_v59 = vadd.f32 %v230_v26, %v148_v57  ;;  %v159_v60 = vadd.f32 %v230_v26, %v158_v58  ;;  %v130_v61 = vpop.f32.mrf.mxu0  ;;  %v140_v62 = vpop.f32.mrf.mxu1 }
  0xa9   :  { %v131_v63 = vadd.f32 %v230_v26, %v130_v61  ;;  %v141_v0 = vadd.f32 %v230_v26, %v140_v62 }
  0xaa   :  { %v173_v1 = vpack.c.bf16 %v149_v59, %v149_v59  ;;  %v177_v2 = vpack.c.bf16 %v159_v60, %v159_v60 }
  0xab   :  { %v166_v3 = vpack.c.bf16 %v131_v63, %v131_v63  ;;  %v170_v4 = vpack.c.bf16 %v141_v0, %v141_v0 }
  0xac   :  { %190 = vst.msk [vmem:[%s436_s3 + $0x28] sm:$0xf] %vm179_vm1, %v173_v1 }
  0xad   :  { %194 = vst.msk [vmem:[%s436_s3 + $0x38] sm:$0xf] %vm179_vm1, %v177_v2 }
  0xae   :  { %183 = vst.msk [vmem:[%s436_s3 + $0xc] sm:$0xf] %vm179_vm1, %v166_v3 }
  0xaf   :  { %187 = vst.msk [vmem:[%s436_s3 + $0x1c] sm:$0xf] %vm179_vm1, %v170_v4  ;;  %v150_v5 = vpop.f32.mrf.mxu2  ;;  %v160_v6 = vpop.f32.mrf.mxu3 }
  0xb0   :  { %v151_v7 = vadd.f32 %v230_v26, %v150_v5  ;;  %v161_v8 = vadd.f32 %v230_v26, %v160_v6 }
  0xb2   :  { %v174_v9 = vpack.c.bf16 %v151_v7, %v151_v7  ;;  %v178_v10 = vpack.c.bf16 %v161_v8, %v161_v8 }
  0xb4   :  { %191 = vst.msk [vmem:[%s436_s3 + $0x2c] sm:$0xf] %vm179_vm1, %v174_v9 }
  0xb5   :  { %195 = vst.msk [vmem:[%s436_s3 + $0x3c] sm:$0xf] %vm179_vm1, %v178_v10 }
  0xb6   :  { %200 = vsyncpa [#allocation3], 1 }
  0xb7   :  { %201 = vsyncpa [#allocation5], 1 }

// kernel: sub.51
= control target key start
LH: loop header
LB: loop body
LE: loop exit
PB: predicated region body
PF: predicated region fallthrough
CT: control target
= control target key end

     0   :  { %vm36_vm0 = vcmask 1047556   ;;  %vm38_vm1 = vcmask 31744   ;;  %s132_s22 = smov 4   ;;  %s133_s23 = smov 8   ;;  %vm54_vm2 = vcmask 130144   ;;  %vm70_vm3 = vcmask 97344   ;;  %s188_s0 = inlined_call_operand.vmem [shape: f32[4,4,4,2], index: 0, kind: input, shape index: {}]   ;;  %s189_s1 = inlined_call_operand.vmem [shape: f32[4,16,2], index: 1, kind: output, shape index: {}]  }
   0x1   :  { %v118_v0 = vld [vmem:[%s188_s0 + $0x1c] sm:$0xf]  ;;  %v119_v1 = vld [vmem:[%s188_s0 + $0x18] sm:$0xf]  ;;  %v120_v2 = vld [vmem:[%s188_s0 + $0x14] sm:$0xf] }
   0x2   :  { %7 = vst [vmem:[#allocation1 + $0x38] sm:$0xf] %v118_v0  ;;  %v121_v3 = vld [vmem:[%s188_s0 + $0x10] sm:$0xf]  ;;  %v122_v4 = vld [vmem:[%s188_s0 + $0xc] sm:$0xf] }
   0x3   :  { %11 = vst [vmem:[#allocation1 + $0x30] sm:$0xf] %v119_v1  ;;  %v123_v5 = vld [vmem:[%s188_s0 + $0x8] sm:$0xf]  ;;  %v124_v6 = vld [vmem:[%s188_s0 + $0x4] sm:$0xf] }
   0x4   :  { %15 = vst [vmem:[#allocation1 + $0x28] sm:$0xf] %v120_v2  ;;  %v32_v7 = vld [vmem:[%s188_s0] sm:$0xf]  ;;  %s131_s0 = smov 12   ;;  %vm86_vm4 = vcmask 64544  }
   0x5   :  { %19 = vst [vmem:[#allocation1 + $0x20] sm:$0xf] %v121_v3 }
   0x6   :  { %23 = vst [vmem:[#allocation1 + $0x18] sm:$0xf] %v122_v4 }
   0x7   :  { %27 = vst [vmem:[#allocation1 + $0x10] sm:$0xf] %v123_v5 }
   0x8   :  { %31 = vst [vmem:[#allocation1 + $0x8] sm:$0xf] %v124_v6 }
   0x9   :  { %33 = vst [vmem:[#allocation1] sm:$0xf] %v32_v7 }
   0xc   :  { %v49_v8 = vld [vmem:[#allocation1 + $0x3] ss:$8 sm:$0xf0]   ;;  %v35_v9 = vld [vmem:[#allocation1] ss:$8 sm:$0xf0]  }
   0xd   :  { %v81_v10 = vld [vmem:[#allocation1 + $0x1] ss:$8 sm:$0xf0]   ;;  %v65_v17 = vld [vmem:[#allocation1 + $0x2] ss:$8 sm:$0xf0]  }
  0x10   :  { %v34_v11 = vld [vmem:[#allocation1] ss:$8 sm:$0xf]   ;;  %v47_v12 = vld [vmem:[#allocation1 + $0x3] ss:$8 sm:$0xf]  }
  0x11   :  { %v51_v13 = vsel %vm36_vm0, %v49_v8, %v47_v12  ;;  %v37_v14 = vsel %vm36_vm0, %v35_v9, %v34_v11  ;;  %v79_v15 = vld [vmem:[#allocation1 + $0x1] ss:$8 sm:$0xf]   ;;  %v63_v18 = vld [vmem:[#allocation1 + $0x2] ss:$8 sm:$0xf]  }
  0x12   :  { %52 = vrot.lane.b32.xlu0 %v51_v13, %s131_s0  ;;  %v83_v16 = vsel %vm36_vm0, %v81_v10, %v79_v15  ;;  %39 = vst.msk [vmem:[#allocation0] sm:$0x3] %vm38_vm1, %v37_v14   ;;  %v67_v19 = vsel %vm36_vm0, %v65_v17, %v63_v18 }
  0x13   :  { %84 = vrot.lane.b32.xlu1 %v83_v16, %s132_s22  ;;  %41 = vst.msk [vmem:[#allocation0 + $0x6] sm:$0xc] %vm38_vm1, %v37_v14  }
  0x14   :  { %43 = vst.msk [vmem:[#allocation0 + $0xc] sm:$0x30] %vm38_vm1, %v37_v14  }
  0x15   :  { %45 = vst.msk [vmem:[#allocation0 + $0x12] sm:$0xc0] %vm38_vm1, %v37_v14  }
  0x1a   :  { %68 = vrot.lane.b32.xlu0 %v67_v19, %s133_s23 }
  0x84   :  { %v53_v20 = vpop.permute.xlu0 %52  }
  0x85   :  { %55 = vst.msk [vmem:[#allocation0] sm:$0x3] %vm54_vm2, %v53_v20   ;;  %v85_v21 = vpop.permute.xlu1 %84  }
  0x86   :  { %57 = vst.msk [vmem:[#allocation0 + $0x6] sm:$0xc] %vm54_vm2, %v53_v20  }
  0x87   :  { %59 = vst.msk [vmem:[#allocation0 + $0xc] sm:$0x30] %vm54_vm2, %v53_v20  }
  0x88   :  { %61 = vst.msk [vmem:[#allocation0 + $0x12] sm:$0xc0] %vm54_vm2, %v53_v20  }
  0x8c   :  { %v69_v22 = vpop.permute.xlu0 %68  }
  0x8d   :  { %71 = vst.msk [vmem:[#allocation0] sm:$0x3] %vm70_vm3, %v69_v22  }
  0x8e   :  { %73 = vst.msk [vmem:[#allocation0 + $0x6] sm:$0xc] %vm70_vm3, %v69_v22  }
  0x8f   :  { %75 = vst.msk [vmem:[#allocation0 + $0xc] sm:$0x30] %vm70_vm3, %v69_v22  }
  0x90   :  { %77 = vst.msk [vmem:[#allocation0 + $0x12] sm:$0xc0] %vm70_vm3, %v69_v22  }
  0x91   :  { %87 = vst.msk [vmem:[#allocation0] sm:$0x3] %vm86_vm4, %v85_v21  }
  0x92   :  { %89 = vst.msk [vmem:[#allocation0 + $0x6] sm:$0xc] %vm86_vm4, %v85_v21  }
  0x93   :  { %91 = vst.msk [vmem:[#allocation0 + $0xc] sm:$0x30] %vm86_vm4, %v85_v21  }
  0x94   :  { %93 = vst.msk [vmem:[#allocation0 + $0x12] sm:$0xc0] %vm86_vm4, %v85_v21  }
  0x98   :  { %v96_v23 = vld [vmem:[#allocation0] sm:$0x3] }
  0x99   :  { %99 = vst [vmem:[%s189_s1] sm:$0x3] %v96_v23  ;;  %v101_v24 = vld [vmem:[#allocation0 + $0x8] sm:$0x3] }
  0x9a   :  { %125 = vst [vmem:[%s189_s1 + $0x2] sm:$0x3] %v101_v24  ;;  %v107_v25 = vld [vmem:[#allocation0 + $0x10] sm:$0x3] }
  0x9b   :  { %126 = vst [vmem:[%s189_s1 + $0x4] sm:$0x3] %v107_v25  ;;  %v113_v26 = vld [vmem:[#allocation0 + $0x18] sm:$0x3] }
  0x9c   :  { %127 = vst [vmem:[%s189_s1 + $0x6] sm:$0x3] %v113_v26 }

// kernel: run.4
= control target key start
LH: loop header
LB: loop body
LE: loop exit
PB: predicated region body
PF: predicated region fallthrough
CT: control target
= control target key end

     0   :  { %s190_s0 = inlined_call_operand.vmem [shape: f32[32,32], index: 0, kind: input, shape index: {}]   ;;  %s191_s1 = inlined_call_operand.vmem [shape: bf16[32,64], index: 1, kind: input, shape index: {}]   ;;  %s192_s2 = inlined_call_operand.vmem [shape: f32[1,64], index: 2, kind: input, shape index: {}]   ;;  %s193_s3 = inlined_call_operand.hbm [shape: bf16[32,64], index: 3, kind: output, shape index: {}]  }
   0x1   :  { %v106_v0 = vld [vmem:[%s191_s1 + $0x8] sm:$0xff]  ;;  %v105_v1 = vld [vmem:[%s191_s1] sm:$0xff]  ;;  %v18_v4 = vld [vmem:[%s190_s0 + $0x10] sm:$0xff] }
   0x2   :  { %v16_v2 = vld [vmem:[%s190_s0] sm:$0xff]  ;;  %v17_v3 = vld [vmem:[%s190_s0 + $0x8] sm:$0xff]  ;;  %55 = vmatpush.bf16.msra.mxu0 %v106_v0  ;;  %107 = vmatpush.bf16.msra.mxu1 %v106_v0  ;;  %v19_v5 = vld [vmem:[%s190_s0 + $0x18] sm:$0xff] }
   0x3   :  { %8 = vsyncpa [#allocation3], 0  ;;  %v20_v6 = vpack.c.bf16 %v17_v3, %v16_v2  ;;  %v21_v7 = vpack.c.bf16 %v19_v5, %v18_v4  ;;  %vm42_vm0 = vcmask 261120   ;;  %v112_v8 = vld [vmem:[%s192_s2] ss:$0 sm:$0xff]  ;;  %vm72_vm1 = vcmask 519168  }
   0x4   :  { %s139_s0 = smov [#allocation2]   ;;  %s83_s28 = sshll.u32 %s193_s3, 4  ;;  %s84_s28 = int_to_ptr.hbm [resolvable:$true] %s83_s28 }
   0x5   :  { %s81_s25 = sshll.u32 %s139_s0, 4  ;;  %s140_s2 = smov 64   ;;  %s82_s25 = int_to_ptr.vmem [resolvable:$true] %s81_s25 }
   0x6   :  { %56 = vmatpush.bf16.msra.mxu0 %v105_v1  ;;  %108 = vmatpush.bf16.msra.mxu1 %v105_v1  ;;  %s141_s29 = smov 4  }
   0x9   :  { %103 = vmatmul.msk.bf16.vlgmr.msra.gmra.mxu0 %vm42_vm0, %v20_v6  ;;  %104 = vmatmul.msk.bf16.vlgmr.msra.gmra.mxu1 %vm42_vm0, %v21_v7 }
  0x86   :  { %v58_v9 = vpop.f32.mrf.mxu0  ;;  %v63_v10 = vpop.f32.mrf.mxu1 }
  0x87   :  { %v59_v11 = vadd.f32 %v112_v8, %v58_v9  ;;  %v64_v12 = vadd.f32 %v112_v8, %v63_v10 }
  0x89   :  { %v68_v13 = vpack.c.bf16 %v59_v11, %v59_v11  ;;  %v70_v14 = vpack.c.bf16 %v64_v12, %v64_v12 }
  0x8b   :  { %73 = vst.msk [vmem:[#allocation2] sm:$0xf] %vm72_vm1, %v68_v13 }
  0x8c   :  { %75 = vst.msk [vmem:[#allocation2 + $0x8] sm:$0xf] %vm72_vm1, %v70_v14 }
  0x8e   :  { %v60_v15 = vpop.f32.mrf.mxu0  ;;  %v65_v16 = vpop.f32.mrf.mxu1 }
  0x8f   :  { %v61_v17 = vadd.f32 %v112_v8, %v60_v15  ;;  %v66_v18 = vadd.f32 %v112_v8, %v65_v16 }
  0x91   :  { %v69_v19 = vpack.c.bf16 %v61_v17, %v61_v17  ;;  %v71_v20 = vpack.c.bf16 %v66_v18, %v66_v18 }
  0x93   :  { %74 = vst.msk [vmem:[#allocation2 + $0x4] sm:$0xf] %vm72_vm1, %v69_v19 }
  0x94   :  { %76 = vst.msk [vmem:[#allocation2 + $0xc] sm:$0xf] %vm72_vm1, %v71_v20 }
  0x95   :  { %89 = dma.vmem_to_hbm [thread:$0]  %s82_s25, 256, %s84_s28, [#allocation3], %s140_s2, %s140_s2, %s141_s29  }
  0x96   :  { %137 = dma.done.wait [#allocation3], 256  }
  0x97   :  { %138 = vsyncadd [#allocation3], 4294967040 }
  0x98   :  { %94 = vsyncpa [#allocation3], 1 }

// kernel: run.5
= control target key start
LH: loop header
LB: loop body
LE: loop exit
PB: predicated region body
PF: predicated region fallthrough
CT: control target
= control target key end

     0   :  { %10 = vsyncpa [#allocation4], 0  ;;  %s2684_s0 = inlined_call_operand.vmem [shape: bf16[2,64,32], index: 0, kind: input, shape index: {}]   ;;  %s2685_s1 = inlined_call_operand.vmem [shape: bf16[2,16,64], index: 1, kind: input, shape index: {}]   ;;  %s2686_s2 = inlined_call_operand.vmem [shape: bf16[2,4,64,16], index: 2, kind: input, shape index: {}]   ;;  %s2687_s3 = inlined_call_operand.vmem [shape: bf16[32,32], index: 3, kind: input, shape index: {}]   ;;  %s2688_s4 = inlined_call_operand.vmem [shape: f32[1,32], index: 4, kind: input, shape index: {}]   ;;  %s2689_s5 = inlined_call_operand.hbm [shape: f32[2,64,32], index: 5, kind: output, shape index: {}]  }
   0x1   :  { %12 = vsyncpa [#allocation4 + $0x1], 0  ;;  %s2052_s18 = smov 0   ;;  %s2054_s19 = smov 0  }
   0x2   :  { %s2056_s20 = smov 0   ;;  %s2058_s21 = smov 0  }
   0x3 LB: > { %s2073_s22 = sadd.s32 4294967295, %s2009_s21   ;;  %s1575_s23 = sadd.s32 4294967294, %s2009_s21   ;;  %s2009_s21 = sphi %s2058_s21, %s2695_s21   ;;  %s2005_s20 = sphi %s2056_s20, %s2694_s20   ;;  %s2001_s19 = sphi %s2054_s19, %s2693_s19   ;;  %s1997_s18 = sphi %s2052_s18, %s2692_s18  }
   0x4   : > { %s2077_s24 = sadd.s32 1, %s2009_s21   ;;  %s145_s25 = sadd.s32 1, %s2005_s20 }
   0x5   : > { %s142_s26 = ssub.s32 %s2009_s21, %s2077_s24  ;;  %p155_p0 = scmp.ne.s32.totalorder %s2005_s20, %s2001_s19 }
   0x6   : > { %p143_p1 = scmp.eq.s32.totalorder %s142_s26, 0  ;;  %p156_p2 = scmp.eq.s32.totalorder %s2073_s22, 1 }
   0x7   : > { %p161_p3 = scmp.ne.s32.totalorder %s2001_s19, %s1997_s18  ;;  %p162_p4 = scmp.eq.s32.totalorder %s1575_s23, 1 }
   0x8   : > { %s2088_s27 = scalar_select %p143_p1, %s2005_s20, %s145_s25  }
   0x9   : > { %p2090_p5 = por %p156_p2, %p155_p0  ;;  %p2094_p6 = por %p162_p4, %p161_p3 }
   0xa   : > { %p1578_p7 = scmp.ge.s32.totalorder %s2009_s21, 1  ;;  %p210_p8 = scmp.lt.s32.totalorder %s2009_s21, 3 }
   0xc   : > { %p211_p9 = pnand %p1578_p7, %p210_p8 }
   0xd   : > { %p248_p10 = scmp.lt.s32.totalorder (!%p211_p9), %s2073_s22, 1  ;;  %s2011_s14 = smov (!%p211_p9), 96  }
   0xe   : > { %214 = sbr.rel (%p211_p9) target bundleno = 1291 (0x50b), region = 40  ;;  %s2012_s15 = smov (!%p211_p9), 120  }
   0xf   : > { %s2013_s26 = smov (!%p211_p9), 112   ;;  %s2016_s7 = smov (!%p211_p9), 80  }
  0x10   : > { %s2017_s8 = smov (!%p211_p9), 72   ;;  %s2020_s11 = smov (!%p211_p9), 16  }
  0x13   : > { %s249_s30 = scalar_select %p248_p10, %s2073_s22, 1  ;;  %vm339_vm0 = vcmask 64512   ;;  %vm384_vm1 = vcmask 130048   ;;  %vm553_vm2 = vcmask 60416   ;;  %vm824_vm3 = vcmask 126016  }
  0x14   : > { %vm1095_vm4 = vcmask 191616   ;;  %vm1366_vm5 = vcmask 257216   ;;  %vm1423_vm6 = vcmask 261120  }
  0x15   : > { %s1672_s6 = sshll.u32 %s249_s30, 3  ;;  %s1671_s10 = sshll.u32 %s249_s30, 5 }
  0x16   : > { %s257_s9 = scalar_lea.vmem %s2685_s1, %s1672_s6  ;;  %s252_s13 = scalar_lea.vmem %s2684_s0, %s1671_s10 }
  0x17   : > { %v2105_v0 = vld [vmem:[%s257_s9] sm:$0xff]  ;;  %v1675_v3 = vld [vmem:[%s252_s13 + $0x8] sm:$0xff]  ;;  %v1676_v4 = vld [vmem:[%s252_s13 + $0x10] sm:$0xff]  ;;  %s1673_s16 = sshll.u32 %s249_s30, 7  ;;  %s2014_s30 = smov 104  }
  0x18   : > { %v353_v1 = vsel %vm339_vm0, %v2105_v0, 0  ;;  %v1674_v2 = vld [vmem:[%s252_s13] sm:$0xff]  ;;  %485 = vrot.lane.b32.xlu1 %v2105_v0, %s2011_s14  ;;  %s2123_s25 = scalar_lea.vmem %s2686_s2, %s1673_s16  ;;  %v1677_v8 = vld [vmem:[%s252_s13 + $0x18] sm:$0xff]  ;;  %s2015_s6 = smov 88  }
  0x19   : > { %362 = vmatpush.bf16.xpose.msra.mxu0 %v353_v1  ;;  %570 = vrot.lane.b32.xlu2 %v1674_v2, %s2012_s15  ;;  %v1750_v7 = vld [vmem:[%s2123_s25 + $0x8] sm:$0xff]   ;;  %v1687_v16 = vld [vmem:[%s2123_s25] sm:$0xff]   ;;  %v1751_v17 = vld [vmem:[%s2123_s25 + $0x10] sm:$0xff]   ;;  %s2018_s9 = smov 24   ;;  %s2019_s10 = smov 8  }
  0x1a   : > { %v1692_v9 = vunpack.c.l.bf16 %v1750_v7  ;;  %v1693_v13 = vunpack.c.h.bf16 %v1750_v7  ;;  %v1689_v18 = vunpack.c.h.bf16 %v1687_v16  ;;  %v1696_v20 = vunpack.c.l.bf16 %v1751_v17  ;;  %v1752_v7 = vld [vmem:[%s2123_s25 + $0x18] sm:$0xff]   ;;  %s245_s16 = sand.u32 1, %s2001_s19  }
  0x1b   : > { %v1697_v26 = vunpack.c.h.bf16 %v1751_v17  ;;  %v1688_v31 = vunpack.c.l.bf16 %v1687_v16  ;;  %s1579_s17 = sshll.u32 %s245_s16, 6  ;;  %s1474_s12 = scalar_lea.sflag [#allocation4], %s245_s16 }
  0x20   : > { %1606 = vmatmul.msk.bf16.vlgmr.msra.gmra.mxu0 %vm339_vm0, %v1674_v2  ;;  %578 = vrot.lane.b32.xlu1 %v2105_v0, %s2012_s15 }
  0x21   : > { %572 = vrot.lane.b32.xlu2 %v1675_v3, %s2012_s15 }
  0x30   : > { %1607 = vmatmul.msk.bf16.gmra.mxu0 %vm339_vm0, %v1675_v3 }
  0x40   : > { %1608 = vmatmul.msk.bf16.gmra.mxu0 %vm339_vm0, %v1676_v4 }
  0x50   : > { %1609 = vmatmul.msk.bf16.gmra.mxu0 %vm339_vm0, %v1677_v8 }
  0x73   : > { %v571_v34 = vpop.permute.xlu2 %570 }
  0x7b   : > { %v573_v36 = vpop.permute.xlu2 %572 }
  0x8a   : > { %v486_v30 = vpop.permute.xlu1 %485 }
  0x8b   : > { %1765 = vmatpush.bf16.msra.mxu1 %v486_v30  ;;  %1766 = vmatpush.bf16.msra.mxu2 %v486_v30 }
  0x8c   : > { %507 = vmatpush.bf16.msrb.mxu0 %v486_v30  ;;  %1767 = vmatpush.bf16.msra.mxu3 %v486_v30 }
  0x92   : > { %v579_v35 = vpop.permute.xlu1 %578 }
  0x93   : > { %v593_v43 = vsel %vm339_vm0, %v579_v35, 0 }
  0x94   : > { %602 = vmatpush.bf16.xpose.msrb.mxu2 %v593_v43 }
  0x9d   : > { %v364_v5 = vpop.f32.mrf.mxu0 }
  0x9e   : > { %v2140_v32 = vadd.f32 %v1688_v31, %v364_v5 }
  0xa0   : > { %v385_v33 = vsel %vm384_vm1, %v2140_v32, -inf }
  0xa5   : > { %v366_v6 = vpop.f32.mrf.mxu0 }
  0xa6   : > { %v2131_v21 = vadd.f32 %v1689_v18, %v366_v6 }
  0xa8   : > { %v388_v25 = vsel %vm384_vm1, %v2131_v21, -inf }
  0xad   : > { %v369_v10 = vpop.f32.mrf.mxu0 }
  0xae   : > { %v370_v11 = vadd.f32 %v1692_v9, %v369_v10  ;;  %v1701_v10 = vunpack.c.h.bf16 %v1752_v7 }
  0xb0   : > { %v391_v12 = vsel %vm384_vm1, %v370_v11, -inf }
  0xb1   : > { %392 = vmax.xlane.f32.xlu1 %v391_v12 }
  0xb5   : > { %v371_v14 = vpop.f32.mrf.mxu0 }
  0xb6   : > { %v372_v15 = vadd.f32 %v1693_v13, %v371_v14 }
  0xb8   : > { %v394_v19 = vsel %vm384_vm1, %v372_v15, -inf }
  0xb9   : > { %395 = vmax.xlane.f32.xlu2 %v394_v19 }
  0xbd   : > { %v374_v22 = vpop.f32.mrf.mxu0 }
  0xbe   : > { %v375_v23 = vadd.f32 %v1696_v20, %v374_v22 }
  0xc0   : > { %v397_v24 = vsel %vm384_vm1, %v375_v23, -inf }
  0xc1   : > { %398 = vmax.xlane.f32.xlu0 %v397_v24  ;;  %389 = vmax.xlane.f32.xlu2 %v388_v25 }
  0xc5   : > { %v376_v27 = vpop.f32.mrf.mxu0 }
  0xc6   : > { %v377_v28 = vadd.f32 %v1697_v26, %v376_v27 }
  0xc8   : > { %v400_v29 = vsel %vm384_vm1, %v377_v28, -inf }
  0xc9   : > { %401 = vmax.xlane.f32.xlu0 %v400_v29 }
  0xca   : > { %576 = vrot.lane.b32.xlu1 %v1677_v8, %s2012_s15 }
  0xcd   : > { %v379_v6 = vpop.f32.mrf.mxu0 }
  0xd2   : > { %841 = vrot.lane.b32.xlu1 %v1674_v2, %s2013_s26 }
  0xd9   : > { %849 = vrot.lane.b32.xlu2 %v2105_v0, %s2013_s26 }
  0xda   : > { %843 = vrot.lane.b32.xlu1 %v1675_v3, %s2013_s26 }
  0xdd   : > { %574 = vrot.lane.b32.xlu0 %v1676_v4, %s2012_s15 }
  0xe1   : > { %1112 = vrot.lane.b32.xlu2 %v1674_v2, %s2014_s30 }
  0xe2   : > { %1116 = vrot.lane.b32.xlu1 %v1676_v4, %s2014_s30 }
  0xe9   : > { %1114 = vrot.lane.b32.xlu2 %v1675_v3, %s2014_s30 }
  0xf1   : > { %847 = vrot.lane.b32.xlu2 %v1677_v8, %s2013_s26 }
 0x107   : > { %386 = vmax.xlane.f32.xlu0 %v385_v33 }
 0x11b   : > { %1120 = vrot.lane.b32.xlu0 %v2105_v0, %s2014_s30 }
 0x123   : > { %845 = vrot.lane.b32.xlu0 %v1676_v4, %s2013_s26  ;;  %s247_s26 = scalar_lea.vmem [#allocation3], %s1579_s17  ;;  %s1967_s17 = scalar_lea.hbm %s2689_s5, 128 }
 0x124   : > { %v393_v37 = vpop.xlane.xlu1 %392 }
 0x125   : > { %v411_v38 = vsub.f32 %v370_v11, %v393_v37  ;;  %v381_v11 = vpop.f32.mrf.mxu0 }
 0x126   : > { %v382_v12 = vadd.f32 %v1701_v10, %v381_v11 }
 0x127   : > { %v421_v39 = vmul.f32 1.442695, %v411_v38  ;;  %v1757_v38 = vld [vmem:[%s2123_s25 + $0x40] sm:$0xff]  }
 0x128   : > { %v406_v14 = vsel %vm384_vm1, %v382_v12, -inf }
 0x129   : > { %1819 = vpow2.f32 %v421_v39  ;;  %407 = vmax.xlane.f32.xlu2 %v406_v14  ;;  %v1720_v39 = vunpack.c.l.bf16 %v1757_v38  ;;  %v1753_v14 = vld [vmem:[%s2123_s25 + $0x20] sm:$0xff]  }
 0x12b   : > { %1118 = vrot.lane.b32.xlu0 %v1677_v8, %s2014_s30  ;;  %v1700_v8 = vunpack.c.l.bf16 %v1752_v7  ;;  %v1761_v7 = vld [vmem:[%s2123_s25 + $0x60] sm:$0xff]   ;;  %s1685_s30 = sshll.u32 %s2073_s22, 6 }
 0x12c   : > { %v396_v40 = vpop.xlane.xlu2 %395 }
 0x12d   : > { %v412_v41 = vsub.f32 %v372_v15, %v396_v40  ;;  %v380_v9 = vadd.f32 %v1700_v8, %v379_v6 }
 0x12f   : > { %v423_v42 = vmul.f32 1.442695, %v412_v41  ;;  %v2146_v44 = vpop.eup %1819  ;;  %v403_v13 = vsel %vm384_vm1, %v380_v9, -inf }
 0x130   : > { %v459_v48 = vpack.c.bf16 %v2146_v44, %v2146_v44  ;;  %404 = vmax.xlane.f32.xlu1 %v403_v13 }
 0x131   : > { %1821 = vpow2.f32 %v423_v42 }
 0x132   : > { %v475_v52 = vunpack.c.l.b16 %v459_v48 }
 0x134   : > { %v399_v45 = vpop.xlane.xlu0 %398  ;;  %v390_v47 = vpop.xlane.xlu2 %389 }
 0x135   : > { %v413_v46 = vsub.f32 %v375_v23, %v399_v45  ;;  %v410_v16 = vsub.f32 %v2131_v21, %v390_v47 }
 0x137   : > { %v2150_v49 = vpop.eup %1821  ;;  %v425_v51 = vmul.f32 1.442695, %v413_v46  ;;  %v419_v17 = vmul.f32 1.442695, %v410_v16 }
 0x138   : > { %v460_v50 = vpack.c.bf16 %v2150_v49, %v2150_v49 }
 0x139   : > { %1823 = vpow2.f32 %v425_v51 }
 0x13a   : > { %v476_v53 = vunpack.c.l.b16 %v460_v50 }
 0x13c   : > { %v402_v54 = vpop.xlane.xlu0 %401  ;;  %v482_v55 = vpack.c.b16 %v476_v53, %v475_v52  ;;  %v850_v57 = vpop.permute.xlu2 %849 }
 0x13d   : > { %v414_v56 = vsub.f32 %v377_v28, %v402_v54  ;;  %v864_v58 = vsel %vm339_vm0, %v850_v57, 0  ;;  %v577_v60 = vpop.permute.xlu1 %576 }
 0x13e   : > { %1611 = vmatmul.msk.bf16.vlgmr.msra.gmra.mxu1 %vm384_vm1, %v482_v55 }
 0x13f   : > { %v427_v59 = vmul.f32 1.442695, %v414_v56  ;;  %873 = vmatpush.bf16.xpose.msrb.mxu1 %v864_v58  ;;  %v2156_v61 = vpop.eup %1823 }
 0x140   : > { %v461_v62 = vpack.c.bf16 %v2156_v61, %v2156_v61 }
 0x141   : > { %1825 = vpow2.f32 %v427_v59  ;;  %724 = vrot.lane.b32.xlu2 %v2105_v0, %s2015_s6 }
 0x142   : > { %v477_v2 = vunpack.c.l.b16 %v461_v62  ;;  %1827 = vpow2.f32 %v419_v17  ;;  %v1737_v17 = vunpack.c.h.bf16 %v1761_v7 }
 0x144   : > { %v1113_v31 = vpop.permute.xlu2 %1112 }
 0x145   : > { %v842_v4 = vpop.permute.xlu1 %841 }
 0x147   : > { %v2160_v63 = vpop.eup %1825 }
 0x148   : > { %v462_v1 = vpack.c.bf16 %v2160_v63, %v2160_v63  ;;  %v2176_v23 = vpop.eup %1827 }
 0x149   : > { %v458_v21 = vpack.c.bf16 %v2176_v23, %v2176_v23 }
 0x14a   : > { %v478_v3 = vunpack.c.l.b16 %v462_v1 }
 0x14b   : > { %v474_v26 = vunpack.c.l.b16 %v458_v21 }
 0x14c   : > { %v483_v5 = vpack.c.b16 %v478_v3, %v477_v2  ;;  %v1115_v33 = vpop.permute.xlu2 %1114 }
 0x14d   : > { %v844_v20 = vpop.permute.xlu1 %843 }
 0x14e   : > { %1612 = vmatmul.msk.bf16.vlgmr.msra.gmra.mxu2 %vm384_vm1, %v483_v5  ;;  %1622 = vmatmul.msk.bf16.vlgmr.msrb.gmra.mxu1 %vm339_vm0, %v842_v4 }
 0x14f   : > { %v575_v15 = vpop.permute.xlu0 %574 }
 0x155   : > { %v1117_v35 = vpop.permute.xlu1 %1116 }
 0x15e   : > { %1614 = vmatmul.msk.bf16.vlgmr.msrb.gmra.mxu2 %vm339_vm0, %v571_v34  ;;  %1623 = vmatmul.msk.bf16.gmra.mxu1 %vm339_vm0, %v844_v20  ;;  %v848_v34 = vpop.permute.xlu2 %847 }
 0x16e   : > { %1615 = vmatmul.msk.bf16.gmra.mxu2 %vm339_vm0, %v573_v36 }
 0x17a   : > { %v387_v18 = vpop.xlane.xlu0 %386 }
 0x17b   : > { %v409_v19 = vsub.f32 %v2140_v32, %v387_v18 }
 0x17d   : > { %v417_v22 = vmul.f32 1.442695, %v409_v19 }
 0x17e   : > { %1616 = vmatmul.msk.bf16.gmra.mxu2 %vm339_vm0, %v575_v15  ;;  %v1705_v15 = vunpack.c.h.bf16 %v1753_v14 }
 0x17f   : > { %1829 = vpow2.f32 %v417_v22  ;;  %v1721_v22 = vunpack.c.h.bf16 %v1757_v38 }
 0x185   : > { %v2180_v24 = vpop.eup %1829 }
 0x186   : > { %v457_v25 = vpack.c.bf16 %v2180_v24, %v2180_v24 }
 0x188   : > { %v473_v27 = vunpack.c.l.b16 %v457_v25  ;;  %v1754_v25 = vld [vmem:[%s2123_s25 + $0x28] sm:$0xff]  }
 0x18a   : > { %v481_v28 = vpack.c.b16 %v474_v26, %v473_v27  ;;  %v1709_v26 = vunpack.c.h.bf16 %v1754_v25 }
 0x18c   : > { %1610 = vmatmul.msk.bf16.vlgmr.msrb.gmra.mxu0 %vm384_vm1, %v481_v28 }
 0x18d   : > { %v1121_v29 = vpop.permute.xlu0 %1120 }
 0x18e   : > { %v1135_v30 = vsel %vm339_vm0, %v1121_v29, 0  ;;  %1617 = vmatmul.msk.bf16.gmra.mxu2 %vm339_vm0, %v577_v60 }
 0x18f   : > { %1144 = vmatpush.bf16.xpose.msra.mxu0 %v1135_v30  ;;  %v1762_v30 = vld [vmem:[%s2123_s25 + $0x68] sm:$0xff]  }
 0x195   : > { %v846_v32 = vpop.permute.xlu0 %845 }
 0x196   : > { %1624 = vmatmul.msk.bf16.gmra.mxu1 %vm339_vm0, %v846_v32  ;;  %v1740_v32 = vunpack.c.l.bf16 %v1762_v30 }
 0x19c   : > { %1630 = vmatmul.msk.bf16.vlgmr.msra.gmra.mxu0 %vm339_vm0, %v1113_v31  ;;  %v408_v46 = vpop.xlane.xlu2 %407 }
 0x19d   : > { %v1119_v40 = vpop.permute.xlu0 %1118  ;;  %v416_v48 = vsub.f32 %v382_v12, %v408_v46 }
 0x19f   : > { %v431_v51 = vmul.f32 1.442695, %v416_v48  ;;  %v1759_v48 = vld [vmem:[%s2123_s25 + $0x50] sm:$0xff]  }
 0x1a3   : > { %v405_v45 = vpop.xlane.xlu1 %404 }
 0x1a4   : > { %v415_v47 = vsub.f32 %v380_v9, %v405_v45  ;;  %v1736_v9 = vunpack.c.l.bf16 %v1761_v7  ;;  %v725_v10 = vpop.permute.xlu2 %724 }
 0x1a5   : > { %746 = vmatpush.bf16.msrb.mxu3 %v725_v10 }
 0x1a6   : > { %1625 = vmatmul.msk.bf16.gmra.mxu1 %vm339_vm0, %v848_v34  ;;  %v429_v50 = vmul.f32 1.442695, %v415_v47  ;;  %v1741_v47 = vunpack.c.h.bf16 %v1762_v30 }
 0x1a8   : > { %1831 = vpow2.f32 %v429_v50 }
 0x1a9   : > { %1833 = vpow2.f32 %v431_v51  ;;  %v1729_v51 = vunpack.c.h.bf16 %v1759_v48 }
 0x1ac   : > { %1631 = vmatmul.msk.bf16.gmra.mxu0 %vm339_vm0, %v1115_v33 }
 0x1ae   : > { %v2204_v53 = vpop.eup %1831 }
 0x1af   : > { %v2206_v54 = vpop.eup %1833  ;;  %v463_v55 = vpack.c.bf16 %v2204_v53, %v2204_v53 }
 0x1b0   : > { %v464_v56 = vpack.c.bf16 %v2206_v54, %v2206_v54 }
 0x1b1   : > { %v479_v57 = vunpack.c.l.b16 %v463_v55 }
 0x1b2   : > { %v480_v58 = vunpack.c.l.b16 %v464_v56 }
 0x1b4   : > { %v484_v59 = vpack.c.b16 %v480_v58, %v479_v57  ;;  %v1756_v58 = vld [vmem:[%s2123_s25 + $0x38] sm:$0xff]  }
 0x1b6   : > { %1613 = vmatmul.msk.bf16.vlgmr.msra.gmra.mxu3 %vm384_vm1, %v484_v59 }
 0x1bb   : > { %v2191_v36 = vpop.f32.mrf.mxu1 }
 0x1bc   : > { %1632 = vmatmul.msk.bf16.gmra.mxu0 %vm339_vm0, %v1117_v35 }
 0x1c3   : > { %v2194_v37 = vpop.f32.mrf.mxu1 }
 0x1cb   : > { %v875_v41 = vpop.f32.mrf.mxu1 }
 0x1cc   : > { %v2197_v42 = vadd.f32 %v1720_v39, %v875_v41  ;;  %1633 = vmatmul.msk.bf16.gmra.mxu0 %vm339_vm0, %v1119_v40  ;;  %v1704_v40 = vunpack.c.l.bf16 %v1753_v14  ;;  %v1755_v41 = vld [vmem:[%s2123_s25 + $0x30] sm:$0xff]  }
 0x1cd   : > { %v1713_v46 = vunpack.c.h.bf16 %v1755_v41 }
 0x1ce   : > { %v895_v43 = vsel %vm384_vm1, %v2197_v42, -inf }
 0x1cf   : > { %896 = vmax.xlane.f32.xlu2 %v895_v43 }
 0x1d1   : > { %v2202_v52 = vpop.f32.mrf.mxu2 }
 0x1d3   : > { %v877_v4 = vpop.f32.mrf.mxu1 }
 0x1d4   : > { %v2243_v31 = vadd.f32 %v1721_v22, %v877_v4 }
 0x1d6   : > { %v898_v39 = vsel %vm384_vm1, %v2243_v31, -inf }
 0x1d9   : > { %v2213_v60 = vpop.f32.mrf.mxu2 }
 0x1db   : > { %v2222_v8 = vpop.f32.mrf.mxu1 }
 0x1e1   : > { %v604_v62 = vpop.f32.mrf.mxu2 }
 0x1e2   : > { %v2255_v50 = vadd.f32 %v1704_v40, %v604_v62 }
 0x1e3   : > { %v2231_v18 = vpop.f32.mrf.mxu1 }
 0x1e4   : > { %v624_v62 = vsel %vm384_vm1, %v2255_v50, -inf }
 0x1e9   : > { %v606_v1 = vpop.f32.mrf.mxu2 }
 0x1ea   : > { %v2233_v19 = vadd.f32 %v1705_v15, %v606_v1  ;;  %v1728_v1 = vunpack.c.l.bf16 %v1759_v48  ;;  %v1763_v15 = vld [vmem:[%s2123_s25 + $0x70] sm:$0xff]  }
 0x1ec   : > { %v627_v29 = vsel %vm384_vm1, %v2233_v19, -inf }
 0x1f1   : > { %v2215_v2 = vpop.f32.mrf.mxu2 }
 0x1f9   : > { %v611_v5 = vpop.f32.mrf.mxu2 }
 0x1fa   : > { %v2245_v33 = vadd.f32 %v1709_v26, %v611_v5  ;;  %v1708_v5 = vunpack.c.l.bf16 %v1754_v25  ;;  %v1744_v25 = vunpack.c.l.bf16 %v1763_v15  ;;  %v1712_v26 = vunpack.c.l.bf16 %v1755_v41  ;;  %v1758_v41 = vld [vmem:[%s2123_s25 + $0x48] sm:$0xff]  }
 0x1fc   : > { %v633_v45 = vsel %vm384_vm1, %v2245_v33, -inf }
 0x201   : > { %v2224_v12 = vpop.f32.mrf.mxu2 }
 0x209   : > { %v2217_v3 = vpop.f32.mrf.mxu0  ;;  %v616_v27 = vpop.f32.mrf.mxu2 }
 0x20a   : > { %v2257_v55 = vadd.f32 %v1713_v46, %v616_v27 }
 0x20c   : > { %v639_v10 = vsel %vm384_vm1, %v2257_v55, -inf }
 0x211   : > { %v2219_v6 = vpop.f32.mrf.mxu0  ;;  %v619_v43 = vpop.f32.mrf.mxu2 }
 0x213   : > { %v885_v35 = vpop.f32.mrf.mxu1 }
 0x214   : > { %v2270_v14 = vadd.f32 %v1728_v1, %v885_v35  ;;  %v1716_v35 = vunpack.c.l.bf16 %v1756_v58  ;;  %v1764_v1 = vld [vmem:[%s2123_s25 + $0x78] sm:$0xff]  }
 0x216   : > { %v907_v22 = vsel %vm384_vm1, %v2270_v14, -inf  ;;  %v2297_v46 = vadd.f32 %v1716_v35, %v619_v43 }
 0x219   : > { %v1146_v11 = vpop.f32.mrf.mxu0 }
 0x21a   : > { %v2226_v13 = vadd.f32 %v1736_v9, %v1146_v11  ;;  %v1717_v9 = vunpack.c.h.bf16 %v1756_v58  ;;  %v621_v11 = vpop.f32.mrf.mxu2 }
 0x21b   : > { %v887_v57 = vpop.f32.mrf.mxu1 }
 0x21c   : > { %v1166_v16 = vsel %vm384_vm1, %v2226_v13, -inf  ;;  %v2262_v4 = vadd.f32 %v1729_v51, %v887_v57 }
 0x21d   : > { %1167 = vmax.xlane.f32.xlu1 %v1166_v16  ;;  %v2274_v16 = vadd.f32 %v1708_v5, %v2215_v2  ;;  %v1725_v5 = vunpack.c.h.bf16 %v1758_v41 }
 0x21f   : > { %v630_v27 = vsel %vm384_vm1, %v2274_v16, -inf }
 0x221   : > { %v1148_v20 = vpop.f32.mrf.mxu0 }
 0x222   : > { %v2235_v21 = vadd.f32 %v1737_v17, %v1148_v20  ;;  %v2276_v17 = vadd.f32 %v1717_v9, %v621_v11 }
 0x223   : > { %v890_v51 = vpop.f32.mrf.mxu1 }
 0x224   : > { %v1169_v28 = vsel %vm384_vm1, %v2235_v21, -inf }
 0x225   : > { %1170 = vmax.xlane.f32.xlu0 %v1169_v28  ;;  %628 = vmax.xlane.f32.xlu1 %v627_v29  ;;  %v645_v28 = vsel %vm384_vm1, %v2276_v17, -inf  ;;  %v2287_v29 = vadd.f32 %v1712_v26, %v2224_v12  ;;  %v1724_v12 = vunpack.c.l.bf16 %v1758_v41 }
 0x227   : > { %v2304_v57 = vadd.f32 %v1724_v12, %v2222_v8 }
 0x229   : > { %v1151_v34 = vpop.f32.mrf.mxu0  ;;  %v901_v43 = vsel %vm384_vm1, %v2304_v57, -inf }
 0x22a   : > { %v2247_v38 = vadd.f32 %v1740_v32, %v1151_v34  ;;  %v1745_v32 = vunpack.c.h.bf16 %v1763_v15 }
 0x22b   : > { %v892_v26 = vpop.f32.mrf.mxu1 }
 0x22d   : > { %899 = vmax.xlane.f32.xlu0 %v898_v39  ;;  %634 = vmax.xlane.f32.xlu1 %v633_v45  ;;  %v636_v39 = vsel %vm384_vm1, %v2287_v29, -inf  ;;  %v1760_v45 = vld [vmem:[%s2123_s25 + $0x58] sm:$0xff]  }
 0x22e   : > { %v1732_v48 = vunpack.c.l.bf16 %v1760_v45 }
 0x230   : > { %v2306_v58 = vadd.f32 %v1732_v48, %v890_v51 }
 0x231   : > { %v1153_v56 = vpop.f32.mrf.mxu0 }
 0x232   : > { %v2260_v59 = vadd.f32 %v1741_v47, %v1153_v56  ;;  %v642_v56 = vsel %vm384_vm1, %v2297_v46, -inf }
 0x234   : > { %v1175_v7 = vsel %vm384_vm1, %v2260_v59, -inf }
 0x235   : > { %1176 = vmax.xlane.f32.xlu2 %v1175_v7  ;;  %625 = vmax.xlane.f32.xlu0 %v624_v62  ;;  %v913_v7 = vsel %vm384_vm1, %v2306_v58, -inf  ;;  %v1748_v62 = vunpack.c.l.bf16 %v1764_v1 }
 0x236   : > { %640 = vmax.xlane.f32.xlu1 %v639_v10  ;;  %v2314_v10 = vadd.f32 %v1725_v5, %v2231_v18  ;;  %v442_v18 = vsel %vm384_vm1, %v2150_v49, 0.0  ;;  %v1749_v49 = vunpack.c.h.bf16 %v1764_v1 }
 0x238   : > { %v904_v8 = vsel %vm384_vm1, %v2314_v10, -inf }
 0x239   : > { %v1156_v20 = vpop.f32.mrf.mxu0 }
 0x23a   : > { %v2284_v2 = vadd.f32 %v1744_v25, %v1156_v20  ;;  %v433_v20 = vsel %vm384_vm1, %v2180_v24, 0.0  ;;  %v1733_v25 = vunpack.c.h.bf16 %v1760_v45 }
 0x23c   : > { %v1178_v30 = vsel %vm384_vm1, %v2284_v2, -inf }
 0x23d   : > { %631 = vmax.xlane.f32.xlu0 %v630_v27  ;;  %908 = vmax.xlane.f32.xlu2 %v907_v22  ;;  %v445_v22 = vsel %vm384_vm1, %v2156_v61, 0.0  ;;  %v1172_v27 = vsel %vm384_vm1, %v2247_v38, -inf }
 0x23e   : > { %646 = vmax.xlane.f32.xlu1 %v645_v28  ;;  %v2332_v28 = vadd.f32 %v1733_v25, %v892_v26 }
 0x240   : > { %v916_v24 = vsel %vm384_vm1, %v2332_v28, -inf }
 0x241   : > { %v1158_v34 = vpop.f32.mrf.mxu0 }
 0x242   : > { %v2293_v40 = vadd.f32 %v1745_v32, %v1158_v34  ;;  %v897_v34 = vpop.xlane.xlu2 %896 }
 0x243   : > { %v919_v12 = vsub.f32 %v2197_v42, %v897_v34  ;;  %v448_v42 = vsel %vm384_vm1, %v2160_v63, 0.0 }
 0x244   : > { %v1181_v47 = vsel %vm384_vm1, %v2293_v40, -inf }
 0x245   : > { %637 = vmax.xlane.f32.xlu0 %v636_v39  ;;  %1179 = vmax.xlane.f32.xlu2 %v1178_v30  ;;  %v436_v39 = vsel %vm384_vm1, %v2176_v23, 0.0 }
 0x249   : > { %v1161_v9 = vpop.f32.mrf.mxu0 }
 0x24a   : > { %v2316_v11 = vadd.f32 %v1748_v62, %v1161_v9 }
 0x24c   : > { %v1184_v15 = vsel %vm384_vm1, %v2316_v11, -inf }
 0x24d   : > { %643 = vmax.xlane.f32.xlu0 %v642_v56  ;;  %1182 = vmax.xlane.f32.xlu2 %v1181_v47  ;;  %v910_v47 = vsel %vm384_vm1, %v2262_v4, -inf  ;;  %v927_v56 = vmul.f32 1.442695, %v919_v12 }
 0x251   : > { %v1163_v30 = vpop.f32.mrf.mxu0 }
 0x252   : > { %v2336_v32 = vadd.f32 %v1749_v49, %v1163_v30 }
 0x255   : > { %902 = vmax.xlane.f32.xlu0 %v901_v43  ;;  %914 = vmax.xlane.f32.xlu2 %v913_v7 }
 0x257   : > { %995 = vrot.lane.b32.xlu1 %v2105_v0, %s2016_s7 }
 0x25d   : > { %905 = vmax.xlane.f32.xlu0 %v904_v8  ;;  %1185 = vmax.xlane.f32.xlu2 %v1184_v15 }
 0x265   : > { %434 = vadd.xlane.f32.xlu2 %v433_v20 }
 0x26d   : > { %443 = vadd.xlane.f32.xlu2 %v442_v18 }
 0x271   : > { %1266 = vrot.lane.b32.xlu0 %v2105_v0, %s2017_s8  ;;  %v1187_v0 = vsel %vm384_vm1, %v2336_v32, -inf  ;;  %s1485_s8 = scalar_lea.hbm %s2689_s5, %s1685_s30 }
 0x275   : > { %446 = vadd.xlane.f32.xlu2 %v445_v22 }
 0x281   : > { %1173 = vmax.xlane.f32.xlu1 %v1172_v27 }
 0x289   : > { %917 = vmax.xlane.f32.xlu1 %v916_v24 }
 0x290   : > { %v1168_v61 = vpop.xlane.xlu1 %1167 }
 0x291   : > { %1188 = vmax.xlane.f32.xlu1 %v1187_v0  ;;  %v1190_v35 = vsub.f32 %v2226_v13, %v1168_v61  ;;  %v439_v13 = vsel %vm384_vm1, %v2146_v44, 0.0 }
 0x293   : > { %v1198_v48 = vmul.f32 1.442695, %v1190_v35 }
 0x295   : > { %1835 = vpow2.f32 %v1198_v48 }
 0x298   : > { %v1171_v41 = vpop.xlane.xlu0 %1170  ;;  %v629_v1 = vpop.xlane.xlu1 %628 }
 0x299   : > { %437 = vadd.xlane.f32.xlu1 %v436_v39  ;;  %v1191_v45 = vsub.f32 %v2235_v21, %v1171_v41  ;;  %v649_v21 = vsub.f32 %v2233_v19, %v629_v1 }
 0x29b   : > { %911 = vmax.xlane.f32.xlu0 %v910_v47  ;;  %v1200_v51 = vmul.f32 1.442695, %v1191_v45  ;;  %v2353_v7 = vpop.eup %1835  ;;  %v658_v9 = vmul.f32 1.442695, %v649_v21 }
 0x29c   : > { %v1214_v15 = vsel %vm384_vm1, %v2353_v7, 0.0 }
 0x29d   : > { %1837 = vpow2.f32 %v1200_v51 }
 0x29e   : > { %1839 = vpow2.f32 %v927_v56 }
 0x2a0   : > { %v900_v5 = vpop.xlane.xlu0 %899  ;;  %v635_v26 = vpop.xlane.xlu1 %634 }
 0x2a1   : > { %440 = vadd.xlane.f32.xlu1 %v439_v13  ;;  %v920_v23 = vsub.f32 %v2243_v31, %v900_v5  ;;  %v651_v41 = vsub.f32 %v2245_v33, %v635_v26 }
 0x2a3   : > { %v929_v43 = vmul.f32 1.442695, %v920_v23  ;;  %449 = vadd.xlane.f32.xlu0 %v448_v42  ;;  %v2355_v62 = vpop.eup %1837  ;;  %v662_v1 = vmul.f32 1.442695, %v651_v41 }
 0x2a4   : > { %v1840_v44 = vpop.eup %1839  ;;  %v1217_v19 = vsel %vm384_vm1, %v2355_v62, 0.0 }
 0x2a5   : > { %1841 = vpow2.f32 %v929_v43  ;;  %v967_v18 = vpack.c.bf16 %v1840_v44, %v1840_v44  ;;  %v943_v39 = vsel %vm384_vm1, %v1840_v44, 0.0 }
 0x2a6   : > { %1843 = vpow2.f32 %v658_v9 }
 0x2a7   : > { %v2364_v30 = vunpack.c.l.b16 %v967_v18 }
 0x2a8   : > { %v1177_v8 = vpop.xlane.xlu2 %1176  ;;  %v626_v31 = vpop.xlane.xlu0 %625 }
 0x2a9   : > { %v1193_v20 = vsub.f32 %v2260_v59, %v1177_v8  ;;  %1215 = vadd.xlane.f32.xlu1 %v1214_v15  ;;  %v648_v63 = vsub.f32 %v2255_v50, %v626_v31  ;;  %v641_v13 = vpop.xlane.xlu1 %640 }
 0x2ab   : > { %v656_v22 = vmul.f32 1.442695, %v648_v63  ;;  %1218 = vadd.xlane.f32.xlu0 %v1217_v19  ;;  %v1842_v25 = vpop.eup %1841  ;;  %v1204_v24 = vmul.f32 1.442695, %v1193_v20  ;;  %v653_v63 = vsub.f32 %v2257_v55, %v641_v13 }
 0x2ac   : > { %v968_v27 = vpack.c.bf16 %v1842_v25, %v1842_v25  ;;  %v946_v49 = vsel %vm384_vm1, %v1842_v25, 0.0  ;;  %v2370_v61 = vpop.eup %1843 }
 0x2ad   : > { %947 = vadd.xlane.f32.xlu2 %v946_v49  ;;  %1845 = vpow2.f32 %v656_v22  ;;  %v697_v45 = vpack.c.bf16 %v2370_v61, %v2370_v61  ;;  %v666_v25 = vmul.f32 1.442695, %v653_v63 }
 0x2ae   : > { %v2366_v59 = vunpack.c.l.b16 %v968_v27  ;;  %1847 = vpow2.f32 %v1204_v24 }
 0x2af   : > { %v713_v5 = vunpack.c.l.b16 %v697_v45 }
 0x2b0   : > { %v2368_v50 = vpop.xlane.xlu2 %908  ;;  %v632_v0 = vpop.xlane.xlu0 %631  ;;  %v991_v34 = vpack.c.b16 %v2366_v59, %v2364_v30 }
 0x2b1   : > { %v650_v35 = vsub.f32 %v2274_v16, %v632_v0  ;;  %v647_v15 = vpop.xlane.xlu1 %646 }
 0x2b3   : > { %944 = vadd.xlane.f32.xlu0 %v943_v39  ;;  %v1846_v12 = vpop.eup %1845  ;;  %v660_v47 = vmul.f32 1.442695, %v650_v35 }
 0x2b4   : > { %v696_v48 = vpack.c.bf16 %v1846_v12, %v1846_v12  ;;  %v672_v51 = vsel %vm384_vm1, %v1846_v12, 0.0  ;;  %v2380_v56 = vpop.eup %1847 }
 0x2b5   : > { %673 = vadd.xlane.f32.xlu2 %v672_v51  ;;  %1849 = vpow2.f32 %v660_v47  ;;  %v1223_v21 = vsel %vm384_vm1, %v2380_v56, 0.0  ;;  %v923_v51 = vsub.f32 %v2270_v14, %v2368_v50 }
 0x2b6   : > { %v712_v16 = vunpack.c.l.b16 %v696_v48  ;;  %1851 = vpow2.f32 %v662_v1  ;;  %v655_v1 = vsub.f32 %v2276_v17, %v647_v15 }
 0x2b8   : > { %v2382_v23 = vpop.xlane.xlu2 %1179  ;;  %v638_v42 = vpop.xlane.xlu0 %637  ;;  %v720_v33 = vpack.c.b16 %v713_v5, %v712_v16  ;;  %v670_v50 = vmul.f32 1.442695, %v655_v1 }
 0x2b9   : > { %v652_v31 = vsub.f32 %v2287_v29, %v638_v42 }
 0x2ba   : > { %1618 = vmatmul.msk.bf16.vlgmr.msrb.gmra.mxu3 %vm384_vm1, %v720_v33  ;;  %v935_v33 = vmul.f32 1.442695, %v923_v51 }
 0x2bb   : > { %1224 = vadd.xlane.f32.xlu0 %v1223_v21  ;;  %v2387_v43 = vpop.eup %1849  ;;  %v664_v18 = vmul.f32 1.442695, %v652_v31  ;;  %v1239_v31 = vpack.c.bf16 %v2355_v62, %v2355_v62 }
 0x2bc   : > { %v2389_v8 = vpop.eup %1851  ;;  %v698_v20 = vpack.c.bf16 %v2387_v43, %v2387_v43 }
 0x2bd   : > { %v699_v19 = vpack.c.bf16 %v2389_v8, %v2389_v8  ;;  %1853 = vpow2.f32 %v664_v18 }
 0x2be   : > { %v714_v22 = vunpack.c.l.b16 %v698_v20  ;;  %1855 = vpow2.f32 %v666_v25 }
 0x2bf   : > { %v715_v24 = vunpack.c.l.b16 %v699_v19 }
 0x2c0   : > { %v1183_v9 = vpop.xlane.xlu2 %1182  ;;  %v644_v44 = vpop.xlane.xlu0 %643 }
 0x2c1   : > { %v721_v29 = vpack.c.b16 %v715_v24, %v714_v22  ;;  %v1195_v55 = vsub.f32 %v2293_v40, %v1183_v9  ;;  %v654_v45 = vsub.f32 %v2297_v46, %v644_v44  ;;  %v1238_v22 = vpack.c.bf16 %v2353_v7, %v2353_v7 }
 0x2c3   : > { %v2402_v39 = vpop.eup %1853  ;;  %v1208_v41 = vmul.f32 1.442695, %v1195_v55  ;;  %v668_v16 = vmul.f32 1.442695, %v654_v45  ;;  %v1254_v55 = vunpack.c.l.b16 %v1238_v22 }
 0x2c4   : > { %v2405_v48 = vpop.eup %1855  ;;  %v700_v40 = vpack.c.bf16 %v2402_v39, %v2402_v39 }
 0x2c5   : > { %v701_v42 = vpack.c.bf16 %v2405_v48, %v2405_v48 }
 0x2c6   : > { %v716_v14 = vunpack.c.l.b16 %v700_v40 }
 0x2c7   : > { %v717_v9 = vunpack.c.l.b16 %v701_v42 }
 0x2c8   : > { %v2397_v26 = vpop.xlane.xlu2 %914  ;;  %v903_v27 = vpop.xlane.xlu0 %902 }
 0x2c9   : > { %v921_v49 = vsub.f32 %v2304_v57, %v903_v27  ;;  %v996_v0 = vpop.permute.xlu1 %995 }
 0x2ca   : > { %1017 = vmatpush.bf16.msra.mxu3 %v996_v0 }
 0x2cb   : > { %v931_v35 = vmul.f32 1.442695, %v921_v49  ;;  %1619 = vmatmul.msk.bf16.gmra.mxu3 %vm384_vm1, %v721_v29  ;;  %v1255_v49 = vunpack.c.l.b16 %v1239_v31 }
 0x2cd   : > { %1857 = vpow2.f32 %v931_v35 }
 0x2ce   : > { %1859 = vpow2.f32 %v1208_v41 }
 0x2d0   : > { %v1186_v12 = vpop.xlane.xlu2 %1185  ;;  %v906_v47 = vpop.xlane.xlu0 %905 }
 0x2d1   : > { %v922_v57 = vsub.f32 %v2314_v10, %v906_v47  ;;  %v1196_v46 = vsub.f32 %v2316_v11, %v1186_v12  ;;  %v722_v11 = vpack.c.b16 %v717_v9, %v716_v14  ;;  %v1241_v9 = vpack.c.bf16 %v2380_v56, %v2380_v56 }
 0x2d3   : > { %v933_v13 = vmul.f32 1.442695, %v922_v57  ;;  %v2413_v5 = vpop.eup %1857  ;;  %v1210_v17 = vmul.f32 1.442695, %v1196_v46  ;;  %v678_v46 = vsel %vm384_vm1, %v2387_v43, 0.0 }
 0x2d4   : > { %v949_v10 = vsel %vm384_vm1, %v2413_v5, 0.0  ;;  %v2420_v44 = vpop.eup %1859 }
 0x2d5   : > { %1861 = vpow2.f32 %v933_v13  ;;  %950 = vadd.xlane.f32.xlu0 %v949_v10  ;;  %v1229_v20 = vsel %vm384_vm1, %v2420_v44, 0.0 }
 0x2d6   : > { %1863 = vpow2.f32 %v668_v16 }
 0x2d8   : > { %v435_v21 = vpop.xlane.xlu2 %434 }
 0x2d9   : > { %1865 = vrcp.f32 %v435_v21 }
 0x2da   : > { %1867 = vpow2.f32 %v935_v33 }
 0x2db   : > { %1869 = vpow2.f32 %v670_v50  ;;  %v2422_v15 = vpop.eup %1861  ;;  %1620 = vmatmul.msk.bf16.gmra.mxu3 %vm384_vm1, %v722_v11  ;;  %v1194_v50 = vsub.f32 %v2284_v2, %v2382_v23 }
 0x2dc   : > { %1871 = vpow2.f32 %v1210_v17  ;;  %v952_v63 = vsel %vm384_vm1, %v2422_v15, 0.0  ;;  %v2431_v19 = vpop.eup %1863  ;;  %v970_v30 = vpack.c.bf16 %v2422_v15, %v2422_v15 }
 0x2dd   : > { %1230 = vadd.xlane.f32.xlu0 %v1229_v20  ;;  %953 = vadd.xlane.f32.xlu2 %v952_v63  ;;  %v702_v29 = vpack.c.bf16 %v2431_v19, %v2431_v19  ;;  %v1206_v21 = vmul.f32 1.442695, %v1194_v50  ;;  %v1257_v20 = vunpack.c.l.b16 %v1241_v9 }
 0x2de   : > { %v986_v56 = vunpack.c.l.b16 %v970_v30  ;;  %v2515_v30 = vpop.f32.mrf.mxu3 }
 0x2df   : > { %v1866_v18 = vpop.eup %1865  ;;  %v718_v47 = vunpack.c.l.b16 %v702_v29 }
 0x2e0   : > { %v2435_v25 = vpop.eup %1867  ;;  %v444_v27 = vpop.xlane.xlu2 %443  ;;  %v537_v24 = vmul.f32 %v1866_v18, %v2217_v3  ;;  %v1262_v3 = vpack.c.b16 %v1255_v49, %v1254_v55 }
 0x2e1   : > { %v2438_v62 = vpop.eup %1869  ;;  %1873 = vrcp.f32 %v444_v27  ;;  %v955_v45 = vsel %vm384_vm1, %v2435_v25, 0.0 }
 0x2e2   : > { %v2440_v0 = vpop.eup %1871  ;;  %v545_v35 = vpack.c.bf16 %v537_v24, %v537_v24  ;;  %v703_v7 = vpack.c.bf16 %v2438_v62, %v2438_v62 }
 0x2e3   : > { %v1267_v41 = vpop.permute.xlu0 %1266  ;;  %v1232_v12 = vsel %vm384_vm1, %v2440_v0, 0.0 }
 0x2e4   : > { %1288 = vmatpush.bf16.msra.mxu2 %v1267_v41  ;;  %554 = vst.msk [vmem:[#allocation2] sm:$0xf] %vm553_vm2, %v545_v35  ;;  %v719_v40 = vunpack.c.l.b16 %v703_v7  ;;  %v1243_v35 = vpack.c.bf16 %v2420_v44, %v2420_v44  ;;  %v675_v7 = vsel %vm384_vm1, %v2370_v61, 0.0 }
 0x2e5   : > { %956 = vadd.xlane.f32.xlu0 %v955_v45  ;;  %1233 = vadd.xlane.f32.xlu2 %v1232_v12 }
 0x2e6   : > { %v723_v13 = vpack.c.b16 %v719_v40, %v718_v47  ;;  %v1259_v45 = vunpack.c.l.b16 %v1243_v35 }
 0x2e7   : > { %v1874_v57 = vpop.eup %1873  ;;  %1634 = vmatmul.msk.bf16.vlgmr.msra.gmra.mxu2 %vm384_vm1, %v1262_v3  ;;  %v690_v3 = vsel %vm384_vm1, %v2431_v19, 0.0  ;;  %v925_v19 = vsub.f32 %v2306_v58, %v2397_v26 }
 0x2e8   : > { %v447_v51 = vpop.xlane.xlu2 %446  ;;  %v540_v1 = vmul.f32 %v1874_v57, %v2194_v37 }
 0x2e9   : > { %1875 = vrcp.f32 %v447_v51 }
 0x2ea   : > { %v548_v16 = vpack.c.bf16 %v540_v1, %v540_v1 }
 0x2eb   : > { %1621 = vmatmul.msk.bf16.gmra.mxu3 %vm384_vm1, %v723_v13 }
 0x2ec   : > { %557 = vst.msk [vmem:[#allocation2 + $0xc] sm:$0xf] %vm553_vm2, %v548_v16  ;;  %v971_v16 = vpack.c.bf16 %v2435_v25, %v2435_v25  ;;  %v1244_v25 = vpack.c.bf16 %v2440_v0, %v2440_v0 }
 0x2ed   : > { %679 = vadd.xlane.f32.xlu2 %v678_v46 }
 0x2ef   : > { %v1876_v42 = vpop.eup %1875 }
 0x2f0   : > { %v541_v10 = vmul.f32 %v1876_v42, %v2202_v52 }
 0x2f2   : > { %v549_v33 = vpack.c.bf16 %v541_v10, %v541_v10 }
 0x2f4   : > { %v1174_v14 = vpop.xlane.xlu1 %1173  ;;  %558 = vst.msk [vmem:[#allocation2 + $0x10] sm:$0xf] %vm553_vm2, %v549_v33  ;;  %v939_v33 = vmul.f32 1.442695, %v925_v19 }
 0x2f5   : > { %v1192_v37 = vsub.f32 %v2247_v38, %v1174_v14  ;;  %v987_v14 = vunpack.c.l.b16 %v971_v16 }
 0x2f7   : > { %v1202_v17 = vmul.f32 1.442695, %v1192_v37 }
 0x2f9   : > { %1877 = vpow2.f32 %v1202_v17 }
 0x2fa   : > { %1879 = vpow2.f32 %v1206_v21 }
 0x2fb   : > { %1626 = vmatmul.msk.bf16.vlgmr.msra.gmra.mxu3 %vm384_vm1, %v991_v34 }
 0x2fc   : > { %v918_v43 = vpop.xlane.xlu1 %917 }
 0x2fd   : > { %v926_v52 = vsub.f32 %v2332_v28, %v918_v43  ;;  %v969_v28 = vpack.c.bf16 %v2413_v5, %v2413_v5 }
 0x2ff   : > { %v1878_v11 = vpop.eup %1877  ;;  %v941_v38 = vmul.f32 1.442695, %v926_v52  ;;  %v985_v49 = vunpack.c.l.b16 %v969_v28  ;;  %v681_v52 = vsel %vm384_vm1, %v2389_v8, 0.0  ;;  %v2520_v28 = vpop.f32.mrf.mxu3 }
 0x300   : > { %v1220_v31 = vsel %vm384_vm1, %v1878_v11, 0.0  ;;  %v1240_v2 = vpack.c.bf16 %v1878_v11, %v1878_v11  ;;  %v1880_v63 = vpop.eup %1879 }
 0x301   : > { %1881 = vpow2.f32 %v941_v38  ;;  %1221 = vadd.xlane.f32.xlu1 %v1220_v31  ;;  %v1226_v27 = vsel %vm384_vm1, %v1880_v63, 0.0  ;;  %v992_v15 = vpack.c.b16 %v986_v56, %v985_v49  ;;  %v1242_v41 = vpack.c.bf16 %v1880_v63, %v1880_v63 }
 0x302   : > { %v1256_v23 = vunpack.c.l.b16 %v1240_v2  ;;  %v1260_v38 = vunpack.c.l.b16 %v1244_v25 }
 0x303   : > { %v1258_v47 = vunpack.c.l.b16 %v1242_v41 }
 0x304   : > { %v1189_v59 = vpop.xlane.xlu1 %1188  ;;  %v1263_v34 = vpack.c.b16 %v1257_v20, %v1256_v23  ;;  %v693_v23 = vsel %vm384_vm1, %v2438_v62, 0.0 }
 0x305   : > { %v1197_v22 = vsub.f32 %v2336_v32, %v1189_v59  ;;  %v1264_v51 = vpack.c.b16 %v1259_v45, %v1258_v47 }
 0x306   : > { %1635 = vmatmul.msk.bf16.gmra.mxu2 %vm384_vm1, %v1263_v34  ;;  %v687_v34 = vsel %vm384_vm1, %v2405_v48, 0.0 }
 0x307   : > { %v2475_v18 = vpop.eup %1881  ;;  %v1212_v29 = vmul.f32 1.442695, %v1197_v22 }
 0x308   : > { %v964_v24 = vsel %vm384_vm1, %v2475_v18, 0.0  ;;  %v974_v8 = vpack.c.bf16 %v2475_v18, %v2475_v18 }
 0x309   : > { %1227 = vadd.xlane.f32.xlu1 %v1226_v27  ;;  %965 = vadd.xlane.f32.xlu0 %v964_v24 }
 0x30a   : > { %v990_v20 = vunpack.c.l.b16 %v974_v8 }
 0x30b   : > { %1627 = vmatmul.msk.bf16.gmra.mxu3 %vm384_vm1, %v992_v15 }
 0x30c   : > { %v438_v5 = vpop.xlane.xlu1 %437 }
 0x30d   : > { %1883 = vrcp.f32 %v438_v5 }
 0x30e   : > { %v912_v55 = vpop.xlane.xlu0 %911  ;;  %1885 = vpow2.f32 %v1212_v29 }
 0x30f   : > { %v924_v32 = vsub.f32 %v2262_v4, %v912_v55 }
 0x311   : > { %v937_v12 = vmul.f32 1.442695, %v924_v32  ;;  %676 = vadd.xlane.f32.xlu1 %v675_v7  ;;  %691 = vadd.xlane.f32.xlu0 %v690_v3 }
 0x313   : > { %v1884_v57 = vpop.eup %1883  ;;  %1887 = vpow2.f32 %v937_v12 }
 0x314   : > { %v441_v44 = vpop.xlane.xlu1 %440  ;;  %v538_v40 = vmul.f32 %v1884_v57, %v2219_v6  ;;  %v1886_v1 = vpop.eup %1885 }
 0x315   : > { %1889 = vrcp.f32 %v441_v44  ;;  %v1235_v13 = vsel %vm384_vm1, %v1886_v1, 0.0  ;;  %v1245_v50 = vpack.c.bf16 %v1886_v1, %v1886_v1 }
 0x316   : > { %1636 = vmatmul.msk.bf16.gmra.mxu2 %vm384_vm1, %v1264_v51  ;;  %v450_v4 = vpop.xlane.xlu0 %449  ;;  %v546_v61 = vpack.c.bf16 %v538_v40, %v538_v40 }
 0x317   : > { %1891 = vrcp.f32 %v450_v4  ;;  %v1261_v9 = vunpack.c.l.b16 %v1245_v50 }
 0x318   : > { %555 = vst.msk [vmem:[#allocation2 + $0x4] sm:$0xf] %vm553_vm2, %v546_v61  ;;  %1893 = vpow2.f32 %v939_v33 }
 0x319   : > { %v1888_v46 = vpop.eup %1887  ;;  %1236 = vadd.xlane.f32.xlu1 %v1235_v13  ;;  %v1265_v0 = vpack.c.b16 %v1261_v9, %v1260_v38 }
 0x31a   : > { %v958_v6 = vsel %vm384_vm1, %v1888_v46, 0.0  ;;  %v972_v42 = vpack.c.bf16 %v1888_v46, %v1888_v46 }
 0x31b   : > { %v1890_v10 = vpop.eup %1889  ;;  %959 = vadd.xlane.f32.xlu2 %v958_v6 }
 0x31c   : > { %v988_v37 = vunpack.c.l.b16 %v972_v42  ;;  %v539_v58 = vmul.f32 %v1890_v10, %v2191_v36  ;;  %v684_v36 = vsel %vm384_vm1, %v2402_v39, 0.0  ;;  %v1216_v49 = vpop.xlane.xlu1 %1215 }
 0x31d   : > { %v1892_v26 = vpop.eup %1891  ;;  %1895 = vrcp.f32 %v1216_v49 }
 0x31e   : > { %v993_v17 = vpack.c.b16 %v988_v37, %v987_v14  ;;  %v547_v21 = vpack.c.bf16 %v539_v58, %v539_v58  ;;  %v542_v43 = vmul.f32 %v1892_v26, %v2213_v60  ;;  %v1894_v60 = vpop.eup %1893  ;;  %v1219_v62 = vpop.xlane.xlu0 %1218 }
 0x31f   : > { %v961_v31 = vsel %vm384_vm1, %v1894_v60, 0.0  ;;  %v973_v2 = vpack.c.bf16 %v1894_v60, %v1894_v60  ;;  %1897 = vrcp.f32 %v1219_v62 }
 0x320   : > { %1628 = vmatmul.msk.bf16.gmra.mxu3 %vm384_vm1, %v993_v17  ;;  %556 = vst.msk [vmem:[#allocation2 + $0x8] sm:$0xf] %vm553_vm2, %v547_v21  ;;  %v550_v11 = vpack.c.bf16 %v542_v43, %v542_v43  ;;  %v2528_v24 = vpop.xlane.xlu2 %947 }
 0x321   : > { %682 = vadd.xlane.f32.xlu1 %v681_v52  ;;  %v989_v39 = vunpack.c.l.b16 %v973_v2 }
 0x322   : > { %559 = vst.msk [vmem:[#allocation2 + $0x14] sm:$0xf] %vm553_vm2, %v550_v11 }
 0x323   : > { %685 = vadd.xlane.f32.xlu2 %v684_v36  ;;  %v994_v59 = vpack.c.b16 %v990_v20, %v989_v39  ;;  %v1896_v29 = vpop.eup %1895 }
 0x325   : > { %v1898_v3 = vpop.eup %1897 }
 0x326   : > { %1637 = vmatmul.msk.bf16.gmra.mxu2 %vm384_vm1, %v1265_v0  ;;  %v2530_v15 = vpop.xlane.xlu0 %944 }
 0x328   : > { %v674_v5 = vpop.xlane.xlu2 %673 }
 0x329   : > { %962 = vadd.xlane.f32.xlu1 %v961_v31 }
 0x32b   : > { %694 = vadd.xlane.f32.xlu2 %v693_v23 }
 0x32e   : > { %v1225_v7 = vpop.xlane.xlu0 %1224 }
 0x330   : > { %1629 = vmatmul.msk.bf16.gmra.mxu3 %vm384_vm1, %v994_v59 }
 0x331   : > { %688 = vadd.xlane.f32.xlu1 %v687_v34 }
 0x33d   : > { %v748_v63 = vpop.f32.mrf.mxu3 }
 0x345   : > { %v750_v56 = vpop.f32.mrf.mxu3 }
 0x348   : > { %v2542_v40 = vpop.xlane.xlu0 %950 }
 0x34e   : > { %v2522_v18 = vpop.f32.mrf.mxu3 }
 0x350   : > { %v2537_v45 = vpop.xlane.xlu2 %953  ;;  %v1231_v19 = vpop.xlane.xlu0 %1230 }
 0x356   : > { %v2524_v22 = vpop.f32.mrf.mxu3 }
 0x358   : > { %v2544_v1 = vpop.xlane.xlu2 %1233  ;;  %v2552_v58 = vpop.xlane.xlu0 %956 }
 0x35e   : > { %v2526_v27 = vpop.f32.mrf.mxu3 }
 0x360   : > { %v680_v16 = vpop.xlane.xlu2 %679 }
 0x366   : > { %v2532_v48 = vpop.f32.mrf.mxu3 }
 0x36a   : > { %v1290_v35 = vpop.f32.mrf.mxu2 }
 0x36b   : > { %v1318_v55 = vmul.f32 %v1896_v29, %v1290_v35 }
 0x36d   : > { %v1326_v41 = vpack.c.bf16 %v1318_v55, %v1318_v55 }
 0x36e   : > { %v2534_v32 = vpop.f32.mrf.mxu3 }
 0x36f   : > { %1342 = vrot.lane.b32.xlu2 %v1326_v41, %s2018_s9 }
 0x372   : > { %v1292_v12 = vpop.f32.mrf.mxu2 }
 0x373   : > { %v1319_v47 = vmul.f32 %v1898_v3, %v1292_v12 }
 0x374   : > { %v1222_v57 = vpop.xlane.xlu1 %1221 }
 0x375   : > { %v1327_v44 = vpack.c.bf16 %v1319_v47, %v1319_v47  ;;  %1899 = vrcp.f32 %v1222_v57 }
 0x376   : > { %v2539_v51 = vpop.f32.mrf.mxu3 }
 0x377   : > { %1344 = vrot.lane.b32.xlu0 %v1327_v44, %s2018_s9 }
 0x37b   : > { %v1900_v6 = vpop.eup %1899 }
 0x37c   : > { %v2546_v4 = vpop.xlane.xlu1 %1227  ;;  %v2556_v8 = vpop.xlane.xlu0 %965 }
 0x37e   : > { %v2548_v61 = vpop.f32.mrf.mxu3 }
 0x384   : > { %v677_v13 = vpop.xlane.xlu1 %676  ;;  %v692_v62 = vpop.xlane.xlu0 %691 }
 0x385   : > { %1901 = vrcp.f32 %v677_v13 }
 0x386   : > { %v1021_v46 = vpop.f32.mrf.mxu3  ;;  %1903 = vrcp.f32 %v674_v5 }
 0x387   : > { %1905 = vrcp.f32 %v1225_v7 }
 0x388   : > { %1907 = vrcp.f32 %v680_v16 }
 0x389   : > { %v1295_v42 = vpop.f32.mrf.mxu2 }
 0x38a   : > { %v1320_v10 = vmul.f32 %v1900_v6, %v1295_v42 }
 0x38b   : > { %v1902_v33 = vpop.eup %1901 }
 0x38c   : > { %v1328_v14 = vpack.c.bf16 %v1320_v10, %v1320_v10  ;;  %v2550_v37 = vpop.xlane.xlu1 %1236  ;;  %v777_v50 = vmul.f32 %v1902_v33, %v750_v56  ;;  %v1904_v25 = vpop.eup %1903 }
 0x38d   : > { %v776_v21 = vmul.f32 %v1904_v25, %v748_v63  ;;  %v1906_v43 = vpop.eup %1905 }
 0x38e   : > { %1346 = vrot.lane.b32.xlu0 %v1328_v14, %s2018_s9  ;;  %v960_v26 = vpop.xlane.xlu2 %959  ;;  %v785_v17 = vpack.c.bf16 %v777_v50, %v777_v50  ;;  %v1024_v52 = vpop.f32.mrf.mxu3 }
 0x38f   : > { %v784_v36 = vpack.c.bf16 %v776_v21, %v776_v21  ;;  %v1908_v60 = vpop.eup %1907 }
 0x390   : > { %802 = vrot.lane.b32.xlu2 %v785_v17, %s2019_s10  ;;  %v778_v2 = vmul.f32 %v1908_v60, %v2522_v18 }
 0x391   : > { %v1297_v9 = vpop.f32.mrf.mxu2 }
 0x392   : > { %v1321_v11 = vmul.f32 %v1906_v43, %v1297_v9  ;;  %v786_v34 = vpack.c.bf16 %v778_v2, %v778_v2 }
 0x394   : > { %v1329_v38 = vpack.c.bf16 %v1321_v11, %v1321_v11  ;;  %v683_v0 = vpop.xlane.xlu1 %682 }
 0x395   : > { %1909 = vrcp.f32 %v683_v0 }
 0x396   : > { %800 = vrot.lane.b32.xlu0 %v784_v36, %s2019_s10  ;;  %1348 = vrot.lane.b32.xlu1 %v1329_v38, %s2018_s9  ;;  %v686_v31 = vpop.xlane.xlu2 %685  ;;  %v1026_v20 = vpop.f32.mrf.mxu3 }
 0x397   : > { %1911 = vrcp.f32 %v686_v31 }
 0x398   : > { %1913 = vrcp.f32 %v1231_v19 }
 0x399   : > { %v1300_v23 = vpop.f32.mrf.mxu2  ;;  %1915 = vrcp.f32 %v2528_v24 }
 0x39a   : > { %1917 = vrcp.f32 %v692_v62 }
 0x39b   : > { %v1910_v39 = vpop.eup %1909 }
 0x39c   : > { %v963_v59 = vpop.xlane.xlu1 %962  ;;  %v779_v29 = vmul.f32 %v1910_v39, %v2524_v22 }
 0x39d   : > { %v1912_v63 = vpop.eup %1911 }
 0x39e   : > { %804 = vrot.lane.b32.xlu0 %v786_v34, %s2019_s10  ;;  %v780_v56 = vmul.f32 %v1912_v63, %v2526_v27  ;;  %v1914_v18 = vpop.eup %1913  ;;  %v787_v7 = vpack.c.bf16 %v779_v29, %v779_v29  ;;  %v454_v34 = vsel %vm384_vm1, %v2206_v54, 0.0 }
 0x39f   : > { %v1916_v3 = vpop.eup %1915 }
 0x3a0   : > { %v788_v49 = vpack.c.bf16 %v780_v56, %v780_v56  ;;  %v1048_v27 = vmul.f32 %v1916_v3, %v1021_v46  ;;  %v1918_v47 = vpop.eup %1917 }
 0x3a1   : > { %v1302_v5 = vpop.f32.mrf.mxu2  ;;  %v782_v44 = vmul.f32 %v1918_v47, %v2534_v32 }
 0x3a2   : > { %808 = vrot.lane.b32.xlu2 %v788_v49, %s2019_s10  ;;  %v1323_v55 = vmul.f32 %v1914_v18, %v1302_v5  ;;  %v1056_v24 = vpack.c.bf16 %v1048_v27, %v1048_v27 }
 0x3a3   : > { %v1029_v35 = vpop.f32.mrf.mxu3 }
 0x3a4   : > { %v689_v41 = vpop.xlane.xlu1 %688  ;;  %v1331_v12 = vpack.c.bf16 %v1323_v55, %v1323_v55 }
 0x3a5   : > { %1919 = vrcp.f32 %v689_v41  ;;  %v1683_v41 = vld [vmem:[%s2687_s3] sm:$0xff] }
 0x3a6   : > { %806 = vrot.lane.b32.xlu0 %v787_v7, %s2019_s10  ;;  %1921 = vrcp.f32 %v2542_v40  ;;  %v790_v40 = vpack.c.bf16 %v782_v44, %v782_v44 }
 0x3a7   : > { %1923 = vrcp.f32 %v2530_v15 }
 0x3a8   : > { %1925 = vrcp.f32 %v960_v26 }
 0x3a9   : > { %1927 = vrcp.f32 %v2537_v45  ;;  %v1305_v43 = vpop.f32.mrf.mxu2 }
 0x3aa   : > { %1352 = vrot.lane.b32.xlu2 %v1331_v12, %s2018_s9  ;;  %1929 = vrcp.f32 %v2546_v4 }
 0x3ab   : > { %v1920_v22 = vpop.eup %1919  ;;  %v1031_v19 = vpop.f32.mrf.mxu3  ;;  %1931 = vrcp.f32 %v963_v59  ;;  %v451_v59 = vsel %vm384_vm1, %v2204_v53, 0.0 }
 0x3ac   : > { %v781_v57 = vmul.f32 %v1920_v22, %v2532_v48  ;;  %v1922_v16 = vpop.eup %1921  ;;  %1933 = vrcp.f32 %v2552_v58 }
 0x3ad   : > { %v1049_v46 = vmul.f32 %v1922_v16, %v1024_v52  ;;  %v1924_v6 = vpop.eup %1923  ;;  %1935 = vrcp.f32 %v2556_v8 }
 0x3ae   : > { %1073 = vrot.lane.b32.xlu0 %v1056_v24, %s2020_s11  ;;  %v789_v13 = vpack.c.bf16 %v781_v57, %v781_v57  ;;  %v1047_v15 = vmul.f32 %v1924_v6, %v2548_v61  ;;  %v1926_v48 = vpop.eup %1925  ;;  %1937 = vrcp.f32 %v2550_v37 }
 0x3af   : > { %v1057_v32 = vpack.c.bf16 %v1049_v46, %v1049_v46  ;;  %v1052_v42 = vmul.f32 %v1926_v48, %v1031_v19  ;;  %v1928_v33 = vpop.eup %1927 }
 0x3b0   : > { %810 = vrot.lane.b32.xlu1 %v789_v13, %s2019_s10  ;;  %v1055_v10 = vpack.c.bf16 %v1047_v15, %v1047_v15  ;;  %v1050_v50 = vmul.f32 %v1928_v33, %v1026_v20  ;;  %v1930_v45 = vpop.eup %1929  ;;  %v695_v20 = vpop.xlane.xlu2 %694 }
 0x3b1   : > { %v1060_v26 = vpack.c.bf16 %v1052_v42, %v1052_v42  ;;  %v1322_v17 = vmul.f32 %v1930_v45, %v1300_v23  ;;  %v1932_v61 = vpop.eup %1931  ;;  %v1307_v8 = vpop.f32.mrf.mxu2  ;;  %1939 = vrcp.f32 %v695_v20 }
 0x3b2   : > { %812 = vrot.lane.b32.xlu2 %v790_v40, %s2019_s10  ;;  %v1058_v4 = vpack.c.bf16 %v1050_v50, %v1050_v50  ;;  %v1934_v9 = vpop.eup %1933  ;;  %1941 = vrcp.f32 %v2544_v1 }
 0x3b3   : > { %v1034_v14 = vpop.f32.mrf.mxu3  ;;  %v1330_v21 = vpack.c.bf16 %v1322_v17, %v1322_v17  ;;  %v1051_v36 = vmul.f32 %v1934_v9, %v1029_v35  ;;  %v1936_v38 = vpop.eup %1935 }
 0x3b4   : > { %v1053_v25 = vmul.f32 %v1932_v61, %v1034_v14  ;;  %v1938_v31 = vpop.eup %1937 }
 0x3b5   : > { %v1059_v58 = vpack.c.bf16 %v1051_v36, %v1051_v36  ;;  %v1325_v2 = vmul.f32 %v1938_v31, %v1307_v8 }
 0x3b6   : > { %1075 = vrot.lane.b32.xlu0 %v1057_v32, %s2020_s11  ;;  %v1061_v52 = vpack.c.bf16 %v1053_v25, %v1053_v25 }
 0x3b7   : > { %v1333_v23 = vpack.c.bf16 %v1325_v2, %v1325_v2  ;;  %v1940_v63 = vpop.eup %1939 }
 0x3b8   : > { %1071 = vrot.lane.b32.xlu1 %v1055_v10, %s2020_s11  ;;  %v783_v56 = vmul.f32 %v1940_v63, %v2539_v51  ;;  %v1942_v29 = vpop.eup %1941  ;;  %v1684_v51 = vld [vmem:[%s2687_s3 + $0x8] sm:$0xff] }
 0x3b9   : > { %v1324_v5 = vmul.f32 %v1942_v29, %v1305_v43  ;;  %1442 = vmatpush.bf16.msra.mxu1 %v1684_v51 }
 0x3ba   : > { %1081 = vrot.lane.b32.xlu2 %v1060_v26, %s2020_s11  ;;  %v791_v49 = vpack.c.bf16 %v783_v56, %v783_v56 }
 0x3bb   : > { %v1036_v11 = vpop.f32.mrf.mxu3  ;;  %v1332_v35 = vpack.c.bf16 %v1324_v5, %v1324_v5 }
 0x3bc   : > { %v1054_v0 = vmul.f32 %v1936_v38, %v1036_v11 }
 0x3bd   : > { %1443 = vmatpush.bf16.msra.mxu1 %v1683_v41 }
 0x3be   : > { %1077 = vrot.lane.b32.xlu0 %v1058_v4, %s2020_s11  ;;  %v1062_v60 = vpack.c.bf16 %v1054_v0, %v1054_v0 }
 0x3c0   : > { %1350 = vrot.lane.b32.xlu1 %v1330_v21, %s2018_s9 }
 0x3c2   : > { %1083 = vrot.lane.b32.xlu2 %v1061_v52, %s2020_s11 }
 0x3c8   : > { %1079 = vrot.lane.b32.xlu1 %v1059_v58, %s2020_s11 }
 0x3c9   : > { %v1343_v39 = vpop.permute.xlu2 %1342 }
 0x3ca   : > { %1085 = vrot.lane.b32.xlu2 %v1062_v60, %s2020_s11  ;;  %s1488_s11 = sshll.u32 %s1485_s8, 4  ;;  %s1489_s11 = int_to_ptr.hbm [resolvable:$true] %s1488_s11 }
 0x3cb   : > { %s1961_s13 = sshra.s32 %s1489_s11, 4  ;;  %s1962_s13 = int_to_ptr.hbm [resolvable:$true] %s1961_s13 }
 0x3cc   : > { %s1963_s22 = scalar_lea.hbm %s1962_s13, 64  ;;  %p1968_p0 = scmp.lt.s32.totalorder %s1962_s13, %s2689_s5 }
 0x3cd   : > { %p1964_p11 = scmp.ne.s32.totalorder %s1962_s13, %s1963_s22  ;;  %p1969_p1 = scmp.lt.s32.totalorder %s1967_s17, %s1963_s22 }
 0x3cf   : > { %p1965_p12 = pnand %p1964_p11, %p2090_p5  ;;  %p1970_p2 = por %p1969_p1, %p1968_p0 }
 0x3d1   : > { %p1966_p13 = pneg %p1965_p12 }
 0x3d2   : > { %1356 = vrot.lane.b32.xlu2 %v1333_v23, %s2018_s9 }
 0x3d3   : > { %p1971_p3 = pnand %p1970_p2, %p1966_p13 }
 0x3e8   : > { %452 = vadd.xlane.f32.xlu0 %v451_v59 }
 0x3e9   : > { %v1345_v62 = vpop.permute.xlu0 %1344 }
 0x3ea   : > { %v803_v37 = vpop.permute.xlu2 %802 }
 0x3eb   : > { %826 = vst.msk [vmem:[#allocation2 + $0x4] sm:$0xf] %vm824_vm3, %v803_v37 }
 0x3f2   : > { %455 = vadd.xlane.f32.xlu1 %v454_v34 }
 0x3fc   : > { %814 = vrot.lane.b32.xlu0 %v791_v49, %s2019_s10  ;;  %v809_v53 = vpop.permute.xlu2 %808 }
 0x3fd   : > { %829 = vst.msk [vmem:[#allocation2 + $0x10] sm:$0xf] %vm824_vm3, %v809_v53 }
 0x400   : > { %v1347_v18 = vpop.permute.xlu0 %1346 }
 0x404   : > { %1354 = vrot.lane.b32.xlu0 %v1332_v35, %s2018_s9  ;;  %v1353_v1 = vpop.permute.xlu2 %1352  ;;  %s1486_s9 = sshll.u32 %s247_s26, 4  ;;  %s1487_s9 = int_to_ptr.vmem [resolvable:$true] %s1486_s9 }
 0x408   : > { %v801_v54 = vpop.permute.xlu0 %800  ;;  %v1349_v27 = vpop.permute.xlu1 %1348 }
 0x409   : > { %825 = vst.msk [vmem:[#allocation2] sm:$0xf] %vm824_vm3, %v801_v54 }
 0x40c   : > { %v813_v3 = vpop.permute.xlu2 %812 }
 0x410   : > { %v805_v55 = vpop.permute.xlu0 %804 }
 0x411   : > { %827 = vst.msk [vmem:[#allocation2 + $0x8] sm:$0xf] %vm824_vm3, %v805_v55 }
 0x414   : > { %v1082_v22 = vpop.permute.xlu2 %1081 }
 0x418   : > { %v807_v7 = vpop.permute.xlu0 %806 }
 0x419   : > { %828 = vst.msk [vmem:[#allocation2 + $0xc] sm:$0xf] %vm824_vm3, %v807_v7 }
 0x41c   : > { %v1084_v15 = vpop.permute.xlu2 %1083 }
 0x420   : > { %v1074_v12 = vpop.permute.xlu0 %1073 }
 0x421   : > { %1097 = vst.msk [vmem:[#allocation2 + $0x4] sm:$0xf] %vm1095_vm4, %v1074_v12 }
 0x422   : > { %1368 = vst.msk [vmem:[#allocation2 + $0x4] sm:$0xf] %vm1366_vm5, %v1345_v62  ;;  %v811_v47 = vpop.permute.xlu1 %810 }
 0x423   : > { %830 = vst.msk [vmem:[#allocation2 + $0x14] sm:$0xf] %vm824_vm3, %v811_v47 }
 0x424   : > { %1101 = vst.msk [vmem:[#allocation2 + $0x14] sm:$0xf] %vm1095_vm4, %v1082_v22  ;;  %v1086_v33 = vpop.permute.xlu2 %1085 }
 0x425   : > { %1372 = vst.msk [vmem:[#allocation2 + $0x14] sm:$0xf] %vm1366_vm5, %v1353_v1 }
 0x428   : > { %v1076_v24 = vpop.permute.xlu0 %1075 }
 0x429   : > { %1098 = vst.msk [vmem:[#allocation2 + $0x8] sm:$0xf] %vm1095_vm4, %v1076_v24 }
 0x42a   : > { %1369 = vst.msk [vmem:[#allocation2 + $0x8] sm:$0xf] %vm1366_vm5, %v1347_v18  ;;  %v1072_v57 = vpop.permute.xlu1 %1071 }
 0x42b   : > { %1096 = vst.msk [vmem:[#allocation2] sm:$0xf] %vm1095_vm4, %v1072_v57 }
 0x42c   : > { %1367 = vst.msk [vmem:[#allocation2] sm:$0xf] %vm1366_vm5, %v1343_v39 }
 0x430   : > { %v1078_v44 = vpop.permute.xlu0 %1077 }
 0x431   : > { %1099 = vst.msk [vmem:[#allocation2 + $0xc] sm:$0xf] %vm1095_vm4, %v1078_v44 }
 0x432   : > { %1370 = vst.msk [vmem:[#allocation2 + $0xc] sm:$0xf] %vm1366_vm5, %v1349_v27  ;;  %v1351_v19 = vpop.permute.xlu1 %1350 }
 0x433   : > { %v1679_v13 = vld [vmem:[#allocation2] sm:$0xff] }
 0x434   : > { %1662 = vmatmul.msk.bf16.vlgmr.msra.gmra.mxu1 %vm1423_vm6, %v1679_v13 }
 0x439   : > { %v1680_v46 = vld [vmem:[#allocation2 + $0x8] sm:$0xff] }
 0x43a   : > { %v1080_v16 = vpop.permute.xlu1 %1079 }
 0x43b   : > { %1100 = vst.msk [vmem:[#allocation2 + $0x10] sm:$0xf] %vm1095_vm4, %v1080_v16 }
 0x43c   : > { %1371 = vst.msk [vmem:[#allocation2 + $0x10] sm:$0xf] %vm1366_vm5, %v1351_v19 }
 0x443   : > { %v1681_v40 = vld [vmem:[#allocation2 + $0x10] sm:$0xff] }
 0x444   : > { %1663 = vmatmul.msk.bf16.gmra.mxu1 %vm1423_vm6, %v1680_v46 }
 0x454   : > { %1664 = vmatmul.msk.bf16.gmra.mxu1 %vm1423_vm6, %v1681_v40 }
 0x45b   : > { %v453_v6 = vpop.xlane.xlu0 %452 }
 0x45c   : > { %1943 = vrcp.f32 %v453_v6 }
 0x462   : > { %v1944_v48 = vpop.eup %1943 }
 0x463   : > { %v543_v32 = vmul.f32 %v1944_v48, %v2515_v30  ;;  %v1357_v30 = vpop.permute.xlu2 %1356 }
 0x465   : > { %v551_v42 = vpack.c.bf16 %v543_v32, %v543_v32  ;;  %v456_v10 = vpop.xlane.xlu1 %455 }
 0x466   : > { %1945 = vrcp.f32 %v456_v10 }
 0x467   : > { %560 = vst.msk [vmem:[#allocation2 + $0x18] sm:$0xf] %vm553_vm2, %v551_v42 }
 0x468   : > { %831 = vst.msk [vmem:[#allocation2 + $0x18] sm:$0xf] %vm824_vm3, %v813_v3 }
 0x469   : > { %1102 = vst.msk [vmem:[#allocation2 + $0x18] sm:$0xf] %vm1095_vm4, %v1084_v15 }
 0x46c   : > { %v1946_v14 = vpop.eup %1945 }
 0x46d   : > { %v544_v50 = vmul.f32 %v1946_v14, %v2520_v28  ;;  %v1818_v28 = vld [vmem:[%s2688_s4] ss:$0 sm:$0xff] }
 0x46e   : > { %v815_v26 = vpop.permute.xlu0 %814 }
 0x46f   : > { %v552_v45 = vpack.c.bf16 %v544_v50, %v544_v50 }
 0x471   : > { %561 = vst.msk [vmem:[#allocation2 + $0x1c] sm:$0xf] %vm553_vm2, %v552_v45 }
 0x472   : > { %832 = vst.msk [vmem:[#allocation2 + $0x1c] sm:$0xf] %vm824_vm3, %v815_v26 }
 0x473   : > { %1103 = vst.msk [vmem:[#allocation2 + $0x1c] sm:$0xf] %vm1095_vm4, %v1086_v33 }
 0x474   : > { %1374 = vst.msk [vmem:[#allocation2 + $0x1c] sm:$0xf] %vm1366_vm5, %v1357_v30 }
 0x476   : > { %v1355_v17 = vpop.permute.xlu0 %1354 }
 0x477   : > { %1373 = vst.msk [vmem:[#allocation2 + $0x18] sm:$0xf] %vm1366_vm5, %v1355_v17 }
 0x47e   : > { %v1682_v61 = vld [vmem:[#allocation2 + $0x18] sm:$0xff] }
 0x47f   : > { %1665 = vmatmul.msk.bf16.gmra.mxu1 %vm1423_vm6, %v1682_v61 }
 0x4b1   : > { %v1445_v4 = vpop.f32.mrf.mxu1 }
 0x4b2   : > { %v1446_v25 = vadd.f32 %v1818_v28, %v1445_v4 }
 0x4b4   : > { %1465 = vst.msk [vmem:[%s247_s26] sm:$0xff] %vm1423_vm6, %v1446_v25 }
 0x4b9   : > { %v1447_v21 = vpop.f32.mrf.mxu1 }
 0x4ba   : > { %v1448_v43 = vadd.f32 %v1818_v28, %v1447_v21 }
 0x4bc   : > { %1466 = vst.msk [vmem:[%s247_s26 + $0x8] sm:$0xff] %vm1423_vm6, %v1448_v43 }
 0x4c1   : > { %v1450_v52 = vpop.f32.mrf.mxu1 }
 0x4c2   : > { %v1451_v9 = vadd.f32 %v1818_v28, %v1450_v52 }
 0x4c4   : > { %1467 = vst.msk [vmem:[%s247_s26 + $0x10] sm:$0xff] %vm1423_vm6, %v1451_v9 }
 0x4c9   : > { %v1452_v11 = vpop.f32.mrf.mxu1 }
 0x4ca   : > { %v1453_v36 = vadd.f32 %v1818_v28, %v1452_v11 }
 0x4cc   : > { %1468 = vst.msk [vmem:[%s247_s26 + $0x18] sm:$0xff] %vm1423_vm6, %v1453_v36 }
 0x4d1   : > { %v1455_v38 = vpop.f32.mrf.mxu1 }
 0x4d2   : > { %v1456_v0 = vadd.f32 %v1818_v28, %v1455_v38 }
 0x4d4   : > { %1469 = vst.msk [vmem:[%s247_s26 + $0x20] sm:$0xff] %vm1423_vm6, %v1456_v0 }
 0x4d9   : > { %v1457_v58 = vpop.f32.mrf.mxu1 }
 0x4da   : > { %v1458_v60 = vadd.f32 %v1818_v28, %v1457_v58 }
 0x4dc   : > { %1470 = vst.msk [vmem:[%s247_s26 + $0x28] sm:$0xff] %vm1423_vm6, %v1458_v60 }
 0x4fc   : > { %v1460_v8 = vpop.f32.mrf.mxu1 }
 0x4fd   : > { %v1461_v31 = vadd.f32 %v1818_v28, %v1460_v8 }
 0x4ff   : > { %1471 = vst.msk [vmem:[%s247_s26 + $0x30] sm:$0xff] %vm1423_vm6, %v1461_v31 }
 0x504   : > { %v1462_v2 = vpop.f32.mrf.mxu1 }
 0x505   : > { %v1463_v23 = vadd.f32 %v1818_v28, %v1462_v2 }
 0x507   : > { %1472 = vst.msk [vmem:[%s247_s26 + $0x38] sm:$0xff] %vm1423_vm6, %v1463_v23 }
 0x508   : > { %1974 = shalt.err (!%p1971_p3)
}
 0x509   : > { %s2021_s16 = smov 128  }
 0x50a   : > { %1768 = dma.vmem_to_hbm [thread:$0]  (%p2090_p5), %s1487_s9, 1024, %s1489_s11, %s1474_s12, %s2021_s16, %s2021_s16, %s2019_s10  }
 0x50b PF: > { %p1774_p4 = scmp.ge.s32.totalorder %s2009_s21, 2  ;;  %s1503_s26 = sand.u32 1, %s1997_s18  }
 0x50c   : > { %s1504_s30 = scalar_lea.sflag [#allocation4], %s1503_s26 }
 0x50d   : > { %p1771_p7 = pnand %p1774_p4, %p2094_p6 }
 0x50f   : > { %p1772_p8 = pneg %p1771_p7 }
 0x511   : > { %1992 = dma.done.wait (%p1772_p8), %s1504_s30, 1024  }
 0x512   : > { %1994 = vsyncadd (%p1772_p8), %s1504_s30, 4294966272  ;;  %p15_p9 = scmp.ge.s32.totalorder %s2077_s24, 4   ;;  %s2692_s18 = smov %s2001_s19 }
 0x513   : > { %s2693_s19 = smov %s2005_s20  ;;  %s2694_s20 = smov %s2088_s27 }
 0x514   : > { %s2695_s21 = smov %s2077_s24  ;;  %17 = sbr.rel (!%p15_p9) target bundleno = 3 (0x3), region = 81 }
 0x519   :  { %1510 = vsyncpa [#allocation4], 1 }
 0x51a   :  { %1512 = vsyncpa [#allocation4 + $0x1], 1 }

</bundles_post_ra>
